<compile_context>
chip_gen: v7x
topology: tpu7x:2x2x1
jax: 0.10.0
libtpu: 0.0.40
codegen_flags: <defaults>
</compile_context>

<pallas_src>
import jax
import jax.numpy as jnp
from jax.experimental import pallas as pl
from jax.experimental.pallas import tpu as pltpu

# Model hyper-parameters (shapes implied by the module's __init__)
CONTEXT_SIZE = 3
EMBEDDING_DIM = 32
VOCAB_SIZE = 512
H1 = 256
H2 = 128
LN_EPS = 1e-5


def _round_up(x, m):
    return ((x + m - 1) // m) * m


def neural_lm_kernel(ids_ref, w1f_ref, b1_ref, g_ref, beta_ref,
                     w2_ref, b2_ref, w3_ref, b3_ref, o_ref):
    """Fused forward for one batch tile.

    ids_ref:  [TM, CONTEXT_SIZE] int32          (streamed per grid step)
    w1f_ref:  [CONTEXT, VOCAB, 256] bf16        (resident; E@W1 folded)
    b1/g/beta:[1, 256] f32
    w2_ref:   [256, 128] bf16,  b2_ref: [1, 128] f32
    w3_ref:   [128, VOCAB] bf16, b3_ref: [1, VOCAB] f32
    o_ref:    [TM, VOCAB] out dtype             (streamed per grid step)
    """
    tm = ids_ref.shape[0]
    vocab_iota = jax.lax.broadcasted_iota(jnp.int32, (tm, VOCAB_SIZE), 1)

    # Embedding gather + fc1 as full-width MXU matmuls (per review):
    #   h1_pre = b1 + sum_j onehot(ids[:, j]) @ (E @ W1[j*E:(j+1)*E, :])
    acc = None
    for j in range(CONTEXT_SIZE):
        onehot = (ids_ref[:, j:j + 1] == vocab_iota).astype(jnp.bfloat16)  # (TM, V)
        d = jnp.dot(onehot, w1f_ref[j],
                    preferred_element_type=jnp.float32)                    # (TM, H1) f32
        acc = d if acc is None else acc + d

    # fc1 bias + tanh (f32 VPU/EUP path: portable across v5e/v6e/v7x)
    h1 = jnp.tanh(acc + b1_ref[...])

    # LayerNorm over last dim (256): single-pass stats (two independent sums)
    inv_n = jnp.float32(1.0 / H1)
    s1 = jnp.sum(h1, axis=-1, keepdims=True)
    s2 = jnp.sum(h1 * h1, axis=-1, keepdims=True)
    mean = s1 * inv_n
    var = s2 * inv_n - mean * mean
    h1 = (h1 - mean) * jax.lax.rsqrt(var + LN_EPS) * g_ref[...] + beta_ref[...]
    # dropout(0.3): identity in inference mode

    # fc2 + tanh (bf16 MXU, f32 accumulate)
    h2 = jnp.tanh(
        jnp.dot(h1.astype(jnp.bfloat16), w2_ref[...],
                preferred_element_type=jnp.float32) + b2_ref[...]
    )
    # dropout(0.3): identity in inference mode

    # fc3 logits (bf16 MXU, f32 accumulate), cast to output dtype (bf16 default)
    o_ref[...] = (
        jnp.dot(h2.astype(jnp.bfloat16), w3_ref[...],
                preferred_element_type=jnp.float32) + b3_ref[...]
    ).astype(o_ref.dtype)


def fold_params(params):
    """Offline prep: fold embedding into fc1 and cast MXU operands to bf16."""
    emb = params["embedding"].astype(jnp.float32)                          # (V, E)
    w1 = params["w1"].astype(jnp.float32).reshape(CONTEXT_SIZE, EMBEDDING_DIM, H1)
    # Compute the product in f32, round ONCE to bf16 (per review).
    w1fold = jnp.einsum("ve,jeh->jvh", emb, w1).astype(jnp.bfloat16)       # (C, V, H1)
    return {
        "w1fold": w1fold,
        "b1": params["b1"],
        "ln_gamma": params["ln_gamma"],
        "ln_beta": params["ln_beta"],
        "w2": params["w2"].astype(jnp.bfloat16),
        "b2": params["b2"],
        "w3": params["w3"].astype(jnp.bfloat16),
        "b3": params["b3"],
    }


def neural_lm_forward(token_ids, folded, *, tm_max=1024, out_dtype=jnp.bfloat16):
    """token_ids: [B, context_size] int32 -> logits [B, vocab_size] (out_dtype)."""
    B = token_ids.shape[0]
    # Smallest grid for tm_max, then the tile that minimizes padding (mult. of 8).
    tm_cap = max(8, min(_round_up(tm_max, 8), _round_up(B, 8)))
    grid = -(-B // tm_cap)
    tm = _round_up(-(-B // grid), 8)
    Bp = tm * grid
    if Bp != B:
        token_ids = jnp.pad(token_ids, ((0, Bp - B), (0, 0)))  # pad with id 0

    def pinned(shape):
        # Weight/bias stays VMEM-resident: same block index every grid step.
        zeros = (0,) * len(shape)
        return pl.BlockSpec(shape, lambda i, _z=zeros: _z)

    out = pl.pallas_call(
        neural_lm_kernel,
        out_shape=jax.ShapeDtypeStruct((Bp, VOCAB_SIZE), out_dtype),
        grid_spec=pltpu.PrefetchScalarGridSpec(
            num_scalar_prefetch=0,
            grid=(grid,),
            in_specs=[
                pl.BlockSpec((tm, CONTEXT_SIZE), lambda i: (i, 0)),   # token ids
                pinned((CONTEXT_SIZE, VOCAB_SIZE, H1)),               # folded E@W1
                pinned((1, H1)),                                      # b1
                pinned((1, H1)),                                      # ln_gamma
                pinned((1, H1)),                                      # ln_beta
                pinned((H1, H2)),                                     # w2
                pinned((1, H2)),                                      # b2
                pinned((H2, VOCAB_SIZE)),                             # w3
                pinned((1, VOCAB_SIZE)),                              # b3
            ],
            out_specs=pl.BlockSpec((tm, VOCAB_SIZE), lambda i: (i, 0)),
        ),
        compiler_params=pltpu.CompilerParams(
            dimension_semantics=("parallel",),   # batch axis independent per step
        ),
    )(
        token_ids,
        folded["w1fold"], folded["b1"],
        folded["ln_gamma"], folded["ln_beta"],
        folded["w2"], folded["b2"],
        folded["w3"], folded["b3"],
    )
    return out[:B]


def init_params(key):
    """Deterministic synthetic parameters (no checkpoint loading)."""
    ks = jax.random.split(key, 5)
    in_dim = CONTEXT_SIZE * EMBEDDING_DIM
    params = {
        "embedding": jax.random.normal(ks[0], (VOCAB_SIZE, EMBEDDING_DIM), jnp.float32) * 0.1,
        # Linear weights stored [in, out] (transposed vs. PyTorch's [out, in])
        "w1": jax.random.normal(ks[1], (in_dim, H1), jnp.float32) * 0.05,
        "b1": jnp.zeros((1, H1), jnp.float32),
        "ln_gamma": jnp.ones((1, H1), jnp.float32),
        "ln_beta": jnp.zeros((1, H1), jnp.float32),
        "w2": jax.random.normal(ks[2], (H1, H2), jnp.float32) * 0.05,
        "b2": jnp.zeros((1, H2), jnp.float32),
        "w3": jax.random.normal(ks[3], (H2, VOCAB_SIZE), jnp.float32) * 0.05,
        "b3": jnp.zeros((1, VOCAB_SIZE), jnp.float32),
    }
    return params


def reference_forward(token_ids, params):
    """Pure-JAX f32 reference mirroring the PyTorch forward (inference mode)."""
    B = token_ids.shape[0]
    x = jnp.take(params["embedding"], token_ids, axis=0).reshape(B, -1)
    h1 = jnp.tanh(x @ params["w1"] + params["b1"])
    mean = jnp.mean(h1, axis=-1, keepdims=True)
    var = jnp.mean(jnp.square(h1 - mean), axis=-1, keepdims=True)
    h1 = (h1 - mean) * jax.lax.rsqrt(var + LN_EPS) * params["ln_gamma"] + params["ln_beta"]
    h2 = jnp.tanh(h1 @ params["w2"] + params["b2"])
    return h2 @ params["w3"] + params["b3"]


if __name__ == "__main__":
    key = jax.random.PRNGKey(0)
    k_param, k_ids, k_ids2 = jax.random.split(key, 3)
    params = init_params(k_param)
    folded = fold_params(params)   # offline embedding-into-fc1 fold + bf16 casts

    # Small batch, f32 output path (single tile, grid=1)
    B = 8
    token_ids = jax.random.randint(k_ids, (B, CONTEXT_SIZE), 0, VOCAB_SIZE, dtype=jnp.int32)
    logits = jax.block_until_ready(
        neural_lm_forward(token_ids, folded, out_dtype=jnp.float32))
    ref = reference_forward(token_ids, params)
    assert logits.shape == (B, VOCAB_SIZE)
    # bf16 MXU operands vs f32 reference -> loosened tolerance
    assert jnp.allclose(logits, ref, atol=3e-2, rtol=3e-2)

    # Larger batch, default bf16 logits (single big tile, grid=1)
    B2 = 600
    token_ids2 = jax.random.randint(k_ids2, (B2, CONTEXT_SIZE), 0, VOCAB_SIZE, dtype=jnp.int32)
    logits2 = jax.block_until_ready(neural_lm_forward(token_ids2, folded))
    ref2 = reference_forward(token_ids2, params)
    assert logits2.shape == (B2, VOCAB_SIZE)
    assert logits2.dtype == jnp.bfloat16
    assert jnp.allclose(logits2.astype(jnp.float32), ref2, atol=3e-2, rtol=3e-2)

    # Same batch with a smaller tile cap: exercises batch tiling / pipelining (grid=3)
    logits3 = jax.block_until_ready(
        neural_lm_forward(token_ids2, folded, tm_max=256))
    assert logits3.shape == (B2, VOCAB_SIZE)
    assert jnp.allclose(logits3.astype(jnp.float32), ref2, atol=3e-2, rtol=3e-2)

    print("KERNEL_OK")
</pallas_src>

<mosaic_0001>
module attributes {stable_mosaic.version = 11 : i64} {
  func.func @neural_lm_kernel(%arg0: i32, %arg1: memref<8x3xi32, #tpu.memory_space<vmem>>, %arg2: memref<3x512x256xbf16, #tpu.memory_space<vmem>>, %arg3: memref<1x256xf32, #tpu.memory_space<vmem>>, %arg4: memref<1x256xf32, #tpu.memory_space<vmem>>, %arg5: memref<1x256xf32, #tpu.memory_space<vmem>>, %arg6: memref<256x128xbf16, #tpu.memory_space<vmem>>, %arg7: memref<1x128xf32, #tpu.memory_space<vmem>>, %arg8: memref<128x512xbf16, #tpu.memory_space<vmem>>, %arg9: memref<1x512xf32, #tpu.memory_space<vmem>>, %arg10: memref<8x512xf32, #tpu.memory_space<vmem>>) attributes {dimension_semantics = [#tpu.dimension_semantics<parallel>], iteration_bounds = array<i64: 1>, scalar_prefetch = 0 : i64, scratch_operands = 0 : i64, tpu.core_type = #tpu.core_type<tc>, window_params = [{transform_indices = @transform_0, window_bounds = array<i64: 8, 3>}, {pipeline_mode = #tpu.pipeline_mode<synchronous>, transform_indices = @transform_1, window_bounds = array<i64: 3, 512, 256>}, {pipeline_mode = #tpu.pipeline_mode<synchronous>, transform_indices = @transform_2, window_bounds = array<i64: 1, 256>}, {pipeline_mode = #tpu.pipeline_mode<synchronous>, transform_indices = @transform_3, window_bounds = array<i64: 1, 256>}, {pipeline_mode = #tpu.pipeline_mode<synchronous>, transform_indices = @transform_4, window_bounds = array<i64: 1, 256>}, {pipeline_mode = #tpu.pipeline_mode<synchronous>, transform_indices = @transform_5, window_bounds = array<i64: 256, 128>}, {pipeline_mode = #tpu.pipeline_mode<synchronous>, transform_indices = @transform_6, window_bounds = array<i64: 1, 128>}, {pipeline_mode = #tpu.pipeline_mode<synchronous>, transform_indices = @transform_7, window_bounds = array<i64: 128, 512>}, {pipeline_mode = #tpu.pipeline_mode<synchronous>, transform_indices = @transform_8, window_bounds = array<i64: 1, 512>}, {transform_indices = @transform_9, window_bounds = array<i64: 8, 512>}]} {
    %0 = tpu.iota {dimensions = array<i32: 1>} : vector<8x512xi32>
    %c0 = arith.constant 0 : index
    %c0_0 = arith.constant 0 : index
    %1 = vector.load %arg1[%c0, %c0_0] : memref<8x3xi32, #tpu.memory_space<vmem>>, vector<8x1xi32>
    %2 = vector.broadcast %1 : vector<8x1xi32> to vector<8x512xi32>
    %3 = arith.cmpi eq, %2, %0 : vector<8x512xi32>
    %4 = arith.extui %3 : vector<8x512xi1> to vector<8x512xi32>
    %5 = arith.sitofp %4 : vector<8x512xi32> to vector<8x512xf32>
    %6 = arith.truncf %5 : vector<8x512xf32> to vector<8x512xbf16>
    %c0_1 = arith.constant 0 : index
    %c0_2 = arith.constant 0 : index
    %c0_3 = arith.constant 0 : index
    %7 = vector.load %arg2[%c0_1, %c0_2, %c0_3] : memref<3x512x256xbf16, #tpu.memory_space<vmem>>, vector<1x512x256xbf16>
    %8 = vector.shape_cast %7 : vector<1x512x256xbf16> to vector<512x256xbf16>
    %cst = arith.constant dense<0.000000e+00> : vector<8x256xf32>
    %9 = tpu.matmul %6, %8, %cst {dimension_numbers = #tpu.dot_dimension_numbers<[1], [0], [0], [1], [0, 0, 1, 1], [], []>} : vector<8x512xbf16>, vector<512x256xbf16>, vector<8x256xf32> -> vector<8x256xf32>
    %c0_4 = arith.constant 0 : index
    %c1 = arith.constant 1 : index
    %10 = vector.load %arg1[%c0_4, %c1] : memref<8x3xi32, #tpu.memory_space<vmem>>, vector<8x1xi32>
    %11 = vector.broadcast %10 : vector<8x1xi32> to vector<8x512xi32>
    %12 = arith.cmpi eq, %11, %0 : vector<8x512xi32>
    %13 = arith.extui %12 : vector<8x512xi1> to vector<8x512xi32>
    %14 = arith.sitofp %13 : vector<8x512xi32> to vector<8x512xf32>
    %15 = arith.truncf %14 : vector<8x512xf32> to vector<8x512xbf16>
    %c1_5 = arith.constant 1 : index
    %c0_6 = arith.constant 0 : index
    %c0_7 = arith.constant 0 : index
    %16 = vector.load %arg2[%c1_5, %c0_6, %c0_7] : memref<3x512x256xbf16, #tpu.memory_space<vmem>>, vector<1x512x256xbf16>
    %17 = vector.shape_cast %16 : vector<1x512x256xbf16> to vector<512x256xbf16>
    %cst_8 = arith.constant dense<0.000000e+00> : vector<8x256xf32>
    %18 = tpu.matmul %15, %17, %cst_8 {dimension_numbers = #tpu.dot_dimension_numbers<[1], [0], [0], [1], [0, 0, 1, 1], [], []>} : vector<8x512xbf16>, vector<512x256xbf16>, vector<8x256xf32> -> vector<8x256xf32>
    %19 = arith.addf %9, %18 : vector<8x256xf32>
    %c0_9 = arith.constant 0 : index
    %c2 = arith.constant 2 : index
    %20 = vector.load %arg1[%c0_9, %c2] : memref<8x3xi32, #tpu.memory_space<vmem>>, vector<8x1xi32>
    %21 = vector.broadcast %20 : vector<8x1xi32> to vector<8x512xi32>
    %22 = arith.cmpi eq, %21, %0 : vector<8x512xi32>
    %23 = arith.extui %22 : vector<8x512xi1> to vector<8x512xi32>
    %24 = arith.sitofp %23 : vector<8x512xi32> to vector<8x512xf32>
    %25 = arith.truncf %24 : vector<8x512xf32> to vector<8x512xbf16>
    %c2_10 = arith.constant 2 : index
    %c0_11 = arith.constant 0 : index
    %c0_12 = arith.constant 0 : index
    %26 = vector.load %arg2[%c2_10, %c0_11, %c0_12] : memref<3x512x256xbf16, #tpu.memory_space<vmem>>, vector<1x512x256xbf16>
    %27 = vector.shape_cast %26 : vector<1x512x256xbf16> to vector<512x256xbf16>
    %cst_13 = arith.constant dense<0.000000e+00> : vector<8x256xf32>
    %28 = tpu.matmul %25, %27, %cst_13 {dimension_numbers = #tpu.dot_dimension_numbers<[1], [0], [0], [1], [0, 0, 1, 1], [], []>} : vector<8x512xbf16>, vector<512x256xbf16>, vector<8x256xf32> -> vector<8x256xf32>
    %29 = arith.addf %19, %28 : vector<8x256xf32>
    %c0_14 = arith.constant 0 : index
    %c0_15 = arith.constant 0 : index
    %30 = vector.load %arg3[%c0_14, %c0_15] : memref<1x256xf32, #tpu.memory_space<vmem>>, vector<1x256xf32>
    %31 = vector.broadcast %30 : vector<1x256xf32> to vector<8x256xf32>
    %32 = arith.addf %29, %31 : vector<8x256xf32>
    %33 = math.tanh %32 : vector<8x256xf32>
    %cst_16 = arith.constant dense<0.000000e+00> : vector<8xf32>
    %34 = vector.multi_reduction <add>, %33, %cst_16 [1] : vector<8x256xf32> to vector<8xf32>
    %35 = vector.shape_cast %34 : vector<8xf32> to vector<8x1xf32>
    %36 = arith.mulf %33, %33 : vector<8x256xf32>
    %cst_17 = arith.constant dense<0.000000e+00> : vector<8xf32>
    %37 = vector.multi_reduction <add>, %36, %cst_17 [1] : vector<8x256xf32> to vector<8xf32>
    %38 = vector.shape_cast %37 : vector<8xf32> to vector<8x1xf32>
    %cst_18 = arith.constant 3.906250e-03 : f32
    %39 = vector.broadcast %cst_18 : f32 to vector<8x1xf32>
    %40 = arith.mulf %35, %39 : vector<8x1xf32>
    %cst_19 = arith.constant 3.906250e-03 : f32
    %41 = vector.broadcast %cst_19 : f32 to vector<8x1xf32>
    %42 = arith.mulf %38, %41 : vector<8x1xf32>
    %43 = arith.mulf %40, %40 : vector<8x1xf32>
    %44 = arith.subf %42, %43 : vector<8x1xf32>
    %45 = vector.broadcast %40 : vector<8x1xf32> to vector<8x256xf32>
    %46 = arith.subf %33, %45 : vector<8x256xf32>
    %cst_20 = arith.constant 9.99999974E-6 : f32
    %47 = vector.broadcast %cst_20 : f32 to vector<8x1xf32>
    %48 = arith.addf %44, %47 : vector<8x1xf32>
    %49 = math.rsqrt %48 : vector<8x1xf32>
    %50 = vector.broadcast %49 : vector<8x1xf32> to vector<8x256xf32>
    %51 = arith.mulf %46, %50 : vector<8x256xf32>
    %c0_21 = arith.constant 0 : index
    %c0_22 = arith.constant 0 : index
    %52 = vector.load %arg4[%c0_21, %c0_22] : memref<1x256xf32, #tpu.memory_space<vmem>>, vector<1x256xf32>
    %53 = vector.broadcast %52 : vector<1x256xf32> to vector<8x256xf32>
    %54 = arith.mulf %51, %53 : vector<8x256xf32>
    %c0_23 = arith.constant 0 : index
    %c0_24 = arith.constant 0 : index
    %55 = vector.load %arg5[%c0_23, %c0_24] : memref<1x256xf32, #tpu.memory_space<vmem>>, vector<1x256xf32>
    %56 = vector.broadcast %55 : vector<1x256xf32> to vector<8x256xf32>
    %57 = arith.addf %54, %56 : vector<8x256xf32>
    %58 = arith.truncf %57 : vector<8x256xf32> to vector<8x256xbf16>
    %c0_25 = arith.constant 0 : index
    %c0_26 = arith.constant 0 : index
    %59 = vector.load %arg6[%c0_25, %c0_26] : memref<256x128xbf16, #tpu.memory_space<vmem>>, vector<256x128xbf16>
    %cst_27 = arith.constant dense<0.000000e+00> : vector<8x128xf32>
    %60 = tpu.matmul %58, %59, %cst_27 {dimension_numbers = #tpu.dot_dimension_numbers<[1], [0], [0], [1], [0, 0, 1, 1], [], []>} : vector<8x256xbf16>, vector<256x128xbf16>, vector<8x128xf32> -> vector<8x128xf32>
    %c0_28 = arith.constant 0 : index
    %c0_29 = arith.constant 0 : index
    %61 = vector.load %arg7[%c0_28, %c0_29] : memref<1x128xf32, #tpu.memory_space<vmem>>, vector<1x128xf32>
    %62 = vector.broadcast %61 : vector<1x128xf32> to vector<8x128xf32>
    %63 = arith.addf %60, %62 : vector<8x128xf32>
    %64 = math.tanh %63 : vector<8x128xf32>
    %65 = arith.truncf %64 : vector<8x128xf32> to vector<8x128xbf16>
    %c0_30 = arith.constant 0 : index
    %c0_31 = arith.constant 0 : index
    %66 = vector.load %arg8[%c0_30, %c0_31] : memref<128x512xbf16, #tpu.memory_space<vmem>>, vector<128x512xbf16>
    %cst_32 = arith.constant dense<0.000000e+00> : vector<8x512xf32>
    %67 = tpu.matmul %65, %66, %cst_32 {dimension_numbers = #tpu.dot_dimension_numbers<[1], [0], [0], [1], [0, 0, 1, 1], [], []>} : vector<8x128xbf16>, vector<128x512xbf16>, vector<8x512xf32> -> vector<8x512xf32>
    %c0_33 = arith.constant 0 : index
    %c0_34 = arith.constant 0 : index
    %68 = vector.load %arg9[%c0_33, %c0_34] : memref<1x512xf32, #tpu.memory_space<vmem>>, vector<1x512xf32>
    %69 = vector.broadcast %68 : vector<1x512xf32> to vector<8x512xf32>
    %70 = arith.addf %67, %69 : vector<8x512xf32>
    %c0_35 = arith.constant 0 : index
    %c0_36 = arith.constant 0 : index
    %71 = vector.load %arg10[%c0_35, %c0_36] : memref<8x512xf32, #tpu.memory_space<vmem>>, vector<8x512xf32>
    tpu.vector_store %arg10[%c0_35, %c0_36], %70 {strides = array<i32>} : memref<8x512xf32, #tpu.memory_space<vmem>>, vector<8x512xf32>,
    return
  }
  func.func @transform_0(%arg0: i32) -> (i32, i32) {
    %c0_i32 = arith.constant 0 : i32
    %c0_i32_0 = arith.constant 0 : i32
    return %arg0, %c0_i32 : i32, i32
  }
  func.func @transform_1(%arg0: i32) -> (i32, i32, i32) {
    %c0_i32 = arith.constant 0 : i32
    %c0_i32_0 = arith.constant 0 : i32
    %c0_i32_1 = arith.constant 0 : i32
    %c0_i32_2 = arith.constant 0 : i32
    return %c0_i32, %c0_i32_0, %c0_i32_1 : i32, i32, i32
  }
  func.func @transform_2(%arg0: i32) -> (i32, i32) {
    %c0_i32 = arith.constant 0 : i32
    %c0_i32_0 = arith.constant 0 : i32
    %c0_i32_1 = arith.constant 0 : i32
    return %c0_i32, %c0_i32_0 : i32, i32
  }
  func.func @transform_3(%arg0: i32) -> (i32, i32) {
    %c0_i32 = arith.constant 0 : i32
    %c0_i32_0 = arith.constant 0 : i32
    %c0_i32_1 = arith.constant 0 : i32
    return %c0_i32, %c0_i32_0 : i32, i32
  }
  func.func @transform_4(%arg0: i32) -> (i32, i32) {
    %c0_i32 = arith.constant 0 : i32
    %c0_i32_0 = arith.constant 0 : i32
    %c0_i32_1 = arith.constant 0 : i32
    return %c0_i32, %c0_i32_0 : i32, i32
  }
  func.func @transform_5(%arg0: i32) -> (i32, i32) {
    %c0_i32 = arith.constant 0 : i32
    %c0_i32_0 = arith.constant 0 : i32
    %c0_i32_1 = arith.constant 0 : i32
    return %c0_i32, %c0_i32_0 : i32, i32
  }
  func.func @transform_6(%arg0: i32) -> (i32, i32) {
    %c0_i32 = arith.constant 0 : i32
    %c0_i32_0 = arith.constant 0 : i32
    %c0_i32_1 = arith.constant 0 : i32
    return %c0_i32, %c0_i32_0 : i32, i32
  }
  func.func @transform_7(%arg0: i32) -> (i32, i32) {
    %c0_i32 = arith.constant 0 : i32
    %c0_i32_0 = arith.constant 0 : i32
    %c0_i32_1 = arith.constant 0 : i32
    return %c0_i32, %c0_i32_0 : i32, i32
  }
  func.func @transform_8(%arg0: i32) -> (i32, i32) {
    %c0_i32 = arith.constant 0 : i32
    %c0_i32_0 = arith.constant 0 : i32
    %c0_i32_1 = arith.constant 0 : i32
    return %c0_i32, %c0_i32_0 : i32, i32
  }
  func.func @transform_9(%arg0: i32) -> (i32, i32) {
    %c0_i32 = arith.constant 0 : i32
    %c0_i32_0 = arith.constant 0 : i32
    return %arg0, %c0_i32 : i32, i32
  }
}

</mosaic_0001>

<bundles_post_ra>
// kernel: tpu_custom_call.1
= control target key start
LH: loop header
LB: loop body
LE: loop exit
PB: predicated region body
PF: predicated region fallthrough
CT: control target
= control target key end

     0   :  { %14 = vsyncpa [#allocation3], 0  ;;  %s3080_s0 = inlined_call_operand.vmem [shape: s32[8,3], index: 0, kind: input, shape index: {}]   ;;  %s3081_s1 = inlined_call_operand.hbm [shape: bf16[3,512,256], index: 1, kind: input, shape index: {}]   ;;  %s3082_s2 = inlined_call_operand.vmem [shape: f32[1,256], index: 2, kind: input, shape index: {}]   ;;  %s3083_s3 = inlined_call_operand.vmem [shape: f32[1,256], index: 3, kind: input, shape index: {}]   ;;  %s3084_s4 = inlined_call_operand.vmem [shape: f32[1,256], index: 4, kind: input, shape index: {}]   ;;  %s3085_s5 = inlined_call_operand.hbm [shape: bf16[256,128], index: 5, kind: input, shape index: {}]   ;;  %s3086_s6 = inlined_call_operand.vmem [shape: f32[1,128], index: 6, kind: input, shape index: {}]   ;;  %s3087_s7 = inlined_call_operand.hbm [shape: bf16[128,512], index: 7, kind: input, shape index: {}]   ;;  %s3088_s8 = inlined_call_operand.vmem [shape: f32[1,512], index: 8, kind: input, shape index: {}]   ;;  %s3089_s9 = inlined_call_operand.hbm [shape: f32[8,512], index: 9, kind: output, shape index: {}]  }
   0x1   :  { %15 = vsyncpa [#allocation6], 0 }
   0x2   :  { %16 = vsyncpa [#allocation4], 0  ;;  %s2868_s30 = smov [#allocation5]   ;;  %s2774_s13 = scalar_lea.hbm %s3085_s5, 2048 }
   0x3   :  { %s42_s10 = sshll.u32 %s2868_s30, 4  ;;  %p2775_p0 = scmp.ne.s32.totalorder %s3085_s5, %s2774_s13  ;;  %s43_s10 = int_to_ptr.vmem [resolvable:$true] %s42_s10 }
   0x4   :  { %p2778_p1 = scmp.lt.u32.totalorder %s2774_s13, %s3085_s5 }
   0x6   :  { %p2780_p2 = pnand %p2778_p1, %p2775_p0 }
   0x8   :  { %2783 = shalt.err (!%p2780_p2)
}
   0x9   :  { %s2784_s18 = scalar_lea.vmem %s43_s10, 2048  ;;  %p2789_p4 = scmp.lt.s32.totalorder %s43_s10, %s43_s10 }
   0xa   :  { %p2785_p3 = scmp.ne.s32.totalorder %s43_s10, %s2784_s18  ;;  %p2790_p5 = scmp.lt.s32.totalorder %s2784_s18, %s2784_s18 }
   0xc   :  { %p2791_p6 = por %p2790_p5, %p2789_p4 }
   0xe   :  { %p2792_p7 = pnand %p2791_p6, %p2785_p3 }
  0x10   :  { %2795 = shalt.err (!%p2792_p7)
}
  0x11   :  { %s2869_s19 = smov 64   ;;  %s2870_s20 = smov 4  }
  0x12   :  { %48 = dma.hbm_to_vmem [thread:$0]  %s3085_s5, 2048, %s43_s10, [#allocation6], %s2869_s19, %s2869_s19, %s2870_s20  }
  0x13   :  { %s2871_s23 = smov [#allocation2]   ;;  %s2796_s27 = scalar_lea.hbm %s3081_s1, 24576 }
  0x14   :  { %s24_s24 = sshll.u32 %s2871_s23, 4  ;;  %p2797_p8 = scmp.ne.s32.totalorder %s3081_s1, %s2796_s27  ;;  %s25_s24 = int_to_ptr.vmem [resolvable:$true] %s24_s24 }
  0x15   :  { %p2800_p9 = scmp.lt.u32.totalorder %s2796_s27, %s3081_s1 }
  0x17   :  { %p2802_p10 = pnand %p2800_p9, %p2797_p8 }
  0x19   :  { %2805 = shalt.err (!%p2802_p10)
}
  0x1a   :  { %s2806_s12 = scalar_lea.vmem %s25_s24, 24576  ;;  %p2811_p12 = scmp.lt.s32.totalorder %s25_s24, %s25_s24 }
  0x1b   :  { %p2807_p11 = scmp.ne.s32.totalorder %s25_s24, %s2806_s12  ;;  %p2812_p13 = scmp.lt.s32.totalorder %s2806_s12, %s2806_s12 }
  0x1d   :  { %p2813_p0 = por %p2812_p13, %p2811_p12 }
  0x1f   :  { %p2814_p1 = pnand %p2813_p0, %p2807_p11 }
  0x21   :  { %2817 = shalt.err (!%p2814_p1)
}
  0x22   :  { %s2872_s5 = smov 128   ;;  %s2873_s10 = smov 8  }
  0x23   :  { %30 = dma.hbm_to_vmem [thread:$0]  %s3081_s1, 24576, %s25_s24, [#allocation3], %s2872_s5, %s2872_s5, %s2873_s10  }
  0x24   :  { %s2874_s15 = smov [#allocation7]   ;;  %s2818_s19 = scalar_lea.hbm %s3087_s7, 4096 }
  0x25   :  { %s56_s16 = sshll.u32 %s2874_s15, 4  ;;  %p2819_p2 = scmp.ne.s32.totalorder %s3087_s7, %s2818_s19  ;;  %s57_s16 = int_to_ptr.vmem [resolvable:$true] %s56_s16 }
  0x26   :  { %p2822_p3 = scmp.lt.u32.totalorder %s2818_s19, %s3087_s7 }
  0x28   :  { %p2824_p4 = pnand %p2822_p3, %p2819_p2 }
  0x2a   :  { %2827 = shalt.err (!%p2824_p4)
}
  0x2b   :  { %s2828_s25 = scalar_lea.vmem %s57_s16, 4096  ;;  %p2833_p6 = scmp.lt.s32.totalorder %s57_s16, %s57_s16 }
  0x2c   :  { %p2829_p5 = scmp.ne.s32.totalorder %s57_s16, %s2828_s25  ;;  %p2834_p7 = scmp.lt.s32.totalorder %s2828_s25, %s2828_s25 }
  0x2e   :  { %p2835_p8 = por %p2834_p7, %p2833_p6 }
  0x30   :  { %p2836_p9 = pnand %p2835_p8, %p2829_p5 }
  0x32   :  { %2839 = shalt.err (!%p2836_p9)
}
  0x33   :  { %s2875_s1 = smov 256   ;;  %s2876_s24 = smov 16  }
  0x34   :  { %62 = dma.hbm_to_vmem [thread:$0]  %s3087_s7, 4096, %s57_s16, [#allocation6], %s2875_s1, %s2875_s1, %s2876_s24  }
  0x35   :  { %2862 = dma.done.wait [#allocation3], 24576  }
  0x36   :  { %2863 = vsyncadd [#allocation3], 4294942720 }
  0x37   :  { %2864 = dma.done.wait [#allocation6], 6144  }
  0x38   :  { %2865 = vsyncadd [#allocation6], 4294961152  ;;  %v2877_v0 = vmov 1   ;;  %v2878_v1 = vmov 2   ;;  %v80_v2 = vld [vmem:[%s3080_s0] sm:$0xff]  ;;  %v2879_v9 = vmov 0  }
  0x39   :  { %2410 = vset.pattern.permute.xlu0 %v2877_v0  ;;  %2412 = vset.pattern.permute.xlu1 %v2878_v1  ;;  %v2414_v3 = vld [vmem:[#allocation2 + $0x204] ss:$8 sps:$4 sm:$0xff]   ;;  %v2418_v5 = vld [vmem:[#allocation2 + $0x200] ss:$8 sps:$4 sm:$0xff]   ;;  %v2420_v7 = vld [vmem:[#allocation2 + $0x214] ss:$8 sps:$4 sm:$0xff]  }
  0x3a   :  { %165 = vperm.xlu0 %2410, %v80_v2   ;;  %1053 = vperm.xlu1 %2412, %v80_v2   ;;  %v2416_v4 = vld [vmem:[#allocation2 + $0x304] ss:$8 sps:$4 sm:$0xff]   ;;  %v2419_v6 = vld [vmem:[#allocation2 + $0x300] ss:$8 sps:$4 sm:$0xff]   ;;  %v2422_v8 = vld [vmem:[#allocation2 + $0x314] ss:$8 sps:$4 sm:$0xff]  }
  0x3b   :  { %568 = vmatprep.subr.bf16.mxu0 %v2414_v3  ;;  %609 = vmatprep.subr.bf16.mxu1 %v2416_v4  ;;  %v2424_v10 = vld [vmem:[#allocation2 + $0x210] ss:$8 sps:$4 sm:$0xff]   ;;  %v2426_v12 = vld [vmem:[#allocation2 + $0x224] ss:$8 sps:$4 sm:$0xff]   ;;  %v2430_v14 = vld [vmem:[#allocation2 + $0x220] ss:$8 sps:$4 sm:$0xff]  }
  0x3c   :  { %569 = vmatpush1.bf16.msra.mxu0 %v2418_v5  ;;  %610 = vmatpush1.bf16.msra.mxu1 %v2419_v6  ;;  %v2425_v11 = vld [vmem:[#allocation2 + $0x310] ss:$8 sps:$4 sm:$0xff]   ;;  %v2428_v13 = vld [vmem:[#allocation2 + $0x324] ss:$8 sps:$4 sm:$0xff]   ;;  %v2431_v15 = vld [vmem:[#allocation2 + $0x320] ss:$8 sps:$4 sm:$0xff]   ;;  %v75_v6 = vlaneseq }
  0x3d   :  { %570 = vmatprep.subr.bf16.mxu0 %v2420_v7  ;;  %611 = vmatprep.subr.bf16.mxu1 %v2422_v8  ;;  %v2432_v16 = vld [vmem:[#allocation2 + $0x234] ss:$8 sps:$4 sm:$0xff]   ;;  %v2436_v18 = vld [vmem:[#allocation2 + $0x230] ss:$8 sps:$4 sm:$0xff]   ;;  %v2438_v20 = vld [vmem:[#allocation2 + $0x244] ss:$8 sps:$4 sm:$0xff]  }
  0x3e   :  { %2411 = vset.pattern.permute.xlu0 %v2879_v9  ;;  %v2434_v17 = vld [vmem:[#allocation2 + $0x334] ss:$8 sps:$4 sm:$0xff]   ;;  %v2437_v19 = vld [vmem:[#allocation2 + $0x330] ss:$8 sps:$4 sm:$0xff]   ;;  %v2440_v21 = vld [vmem:[#allocation2 + $0x344] ss:$8 sps:$4 sm:$0xff]  }
  0x3f   :  { %82 = vperm.xlu0 %2411, %v80_v2   ;;  %v2442_v22 = vld [vmem:[#allocation2 + $0x240] ss:$8 sps:$4 sm:$0xff]   ;;  %v2444_v24 = vld [vmem:[#allocation2 + $0x254] ss:$8 sps:$4 sm:$0xff]   ;;  %v2448_v26 = vld [vmem:[#allocation2 + $0x250] ss:$8 sps:$4 sm:$0xff]  }
  0x40   :  { %571 = vmatpush1.bf16.msra.mxu0 %v2424_v10  ;;  %612 = vmatpush1.bf16.msra.mxu1 %v2425_v11  ;;  %v2443_v23 = vld [vmem:[#allocation2 + $0x340] ss:$8 sps:$4 sm:$0xff]   ;;  %v2446_v25 = vld [vmem:[#allocation2 + $0x354] ss:$8 sps:$4 sm:$0xff]   ;;  %v2449_v27 = vld [vmem:[#allocation2 + $0x350] ss:$8 sps:$4 sm:$0xff]  }
  0x41   :  { %572 = vmatprep.subr.bf16.mxu0 %v2426_v12  ;;  %613 = vmatprep.subr.bf16.mxu1 %v2428_v13  ;;  %v2450_v28 = vld [vmem:[#allocation2 + $0x264] ss:$8 sps:$4 sm:$0xff]   ;;  %v2454_v30 = vld [vmem:[#allocation2 + $0x260] ss:$8 sps:$4 sm:$0xff]   ;;  %v2456_v32 = vld [vmem:[#allocation2 + $0x274] ss:$8 sps:$4 sm:$0xff]  }
  0x42   :  { %v2452_v29 = vld [vmem:[#allocation2 + $0x364] ss:$8 sps:$4 sm:$0xff]   ;;  %v2455_v31 = vld [vmem:[#allocation2 + $0x360] ss:$8 sps:$4 sm:$0xff]   ;;  %v2458_v33 = vld [vmem:[#allocation2 + $0x374] ss:$8 sps:$4 sm:$0xff]  }
  0x43   :  { %2413 = vset.pattern.permute.xlu0 %v2878_v1  ;;  %v2460_v34 = vld [vmem:[#allocation2 + $0x270] ss:$8 sps:$4 sm:$0xff]   ;;  %v2462_v36 = vld [vmem:[#allocation2 + $0x284] ss:$8 sps:$4 sm:$0xff]   ;;  %v2466_v38 = vld [vmem:[#allocation2 + $0x280] ss:$8 sps:$4 sm:$0xff]  }
  0x44   :  { %573 = vmatpush1.bf16.msra.mxu0 %v2430_v14  ;;  %614 = vmatpush1.bf16.msra.mxu1 %v2431_v15  ;;  %v2461_v35 = vld [vmem:[#allocation2 + $0x370] ss:$8 sps:$4 sm:$0xff]   ;;  %v2464_v37 = vld [vmem:[#allocation2 + $0x384] ss:$8 sps:$4 sm:$0xff]   ;;  %v2467_v39 = vld [vmem:[#allocation2 + $0x380] ss:$8 sps:$4 sm:$0xff]  }
  0x45   :  { %574 = vmatprep.subr.bf16.mxu0 %v2432_v16  ;;  %615 = vmatprep.subr.bf16.mxu1 %v2434_v17  ;;  %v2468_v40 = vld [vmem:[#allocation2 + $0x294] ss:$8 sps:$4 sm:$0xff]   ;;  %v2472_v42 = vld [vmem:[#allocation2 + $0x290] ss:$8 sps:$4 sm:$0xff]   ;;  %v2474_v44 = vld [vmem:[#allocation2 + $0x2a4] ss:$8 sps:$4 sm:$0xff]  }
  0x46   :  { %v2470_v41 = vld [vmem:[#allocation2 + $0x394] ss:$8 sps:$4 sm:$0xff]   ;;  %v2473_v43 = vld [vmem:[#allocation2 + $0x390] ss:$8 sps:$4 sm:$0xff]   ;;  %v2476_v45 = vld [vmem:[#allocation2 + $0x3a4] ss:$8 sps:$4 sm:$0xff]  }
  0x47   :  { %v2478_v46 = vld [vmem:[#allocation2 + $0x2a0] ss:$8 sps:$4 sm:$0xff]   ;;  %v2480_v48 = vld [vmem:[#allocation2 + $0x2b4] ss:$8 sps:$4 sm:$0xff]   ;;  %v2484_v50 = vld [vmem:[#allocation2 + $0x2b0] ss:$8 sps:$4 sm:$0xff]  }
  0x48   :  { %575 = vmatpush1.bf16.msra.mxu0 %v2436_v18  ;;  %616 = vmatpush1.bf16.msra.mxu1 %v2437_v19  ;;  %v2479_v47 = vld [vmem:[#allocation2 + $0x3a0] ss:$8 sps:$4 sm:$0xff]   ;;  %v2482_v49 = vld [vmem:[#allocation2 + $0x3b4] ss:$8 sps:$4 sm:$0xff]   ;;  %v2485_v51 = vld [vmem:[#allocation2 + $0x3b0] ss:$8 sps:$4 sm:$0xff]  }
  0x49   :  { %576 = vmatprep.subr.bf16.mxu0 %v2438_v20  ;;  %617 = vmatprep.subr.bf16.mxu1 %v2440_v21  ;;  %v2486_v52 = vld [vmem:[#allocation2 + $0x2c4] ss:$8 sps:$4 sm:$0xff]   ;;  %v2490_v54 = vld [vmem:[#allocation2 + $0x2c0] ss:$8 sps:$4 sm:$0xff]   ;;  %v2492_v56 = vld [vmem:[#allocation2 + $0x2d4] ss:$8 sps:$4 sm:$0xff]  }
  0x4a   :  { %v2488_v53 = vld [vmem:[#allocation2 + $0x3c4] ss:$8 sps:$4 sm:$0xff]   ;;  %v2491_v55 = vld [vmem:[#allocation2 + $0x3c0] ss:$8 sps:$4 sm:$0xff]   ;;  %v2494_v57 = vld [vmem:[#allocation2 + $0x3d4] ss:$8 sps:$4 sm:$0xff]  }
  0x4b   :  { %v2496_v58 = vld [vmem:[#allocation2 + $0x2d0] ss:$8 sps:$4 sm:$0xff]   ;;  %v2498_v60 = vld [vmem:[#allocation2 + $0x2e4] ss:$8 sps:$4 sm:$0xff]   ;;  %v2502_v62 = vld [vmem:[#allocation2 + $0x2e0] ss:$8 sps:$4 sm:$0xff]  }
  0x4c   :  { %577 = vmatpush1.bf16.msra.mxu0 %v2442_v22  ;;  %618 = vmatpush1.bf16.msra.mxu1 %v2443_v23  ;;  %v2497_v59 = vld [vmem:[#allocation2 + $0x3d0] ss:$8 sps:$4 sm:$0xff]   ;;  %v2500_v61 = vld [vmem:[#allocation2 + $0x3e4] ss:$8 sps:$4 sm:$0xff]   ;;  %v2503_v63 = vld [vmem:[#allocation2 + $0x3e0] ss:$8 sps:$4 sm:$0xff]  }
  0x4d   :  { %578 = vmatprep.subr.bf16.mxu0 %v2444_v24  ;;  %619 = vmatprep.subr.bf16.mxu1 %v2446_v25  ;;  %v2504_v0 = vld [vmem:[#allocation2 + $0x2f4] ss:$8 sps:$4 sm:$0xff]   ;;  %v2508_v2 = vld [vmem:[#allocation2 + $0x2f0] ss:$8 sps:$4 sm:$0xff]   ;;  %v2512_v4 = vld [vmem:[#allocation2 + $0x4] ss:$8 sps:$4 sm:$0xff]  }
  0x4e   :  { %v2506_v1 = vld [vmem:[#allocation2 + $0x3f4] ss:$8 sps:$4 sm:$0xff]   ;;  %v2509_v3 = vld [vmem:[#allocation2 + $0x3f0] ss:$8 sps:$4 sm:$0xff]   ;;  %v2515_v5 = vld [vmem:[#allocation2 + $0x104] ss:$8 sps:$4 sm:$0xff]  }
  0x4f   :  { %v2973_v7 = vand.u32 127, %v75_v6  ;;  %v2510_v13 = vld [vmem:[#allocation2] ss:$8 sps:$4 sm:$0xff]   ;;  %v2518_v15 = vld [vmem:[#allocation2 + $0x14] ss:$8 sps:$4 sm:$0xff]  }
  0x50   :  { %579 = vmatpush1.bf16.msra.mxu0 %v2448_v26  ;;  %620 = vmatpush1.bf16.msra.mxu1 %v2449_v27  ;;  %v2513_v14 = vld [vmem:[#allocation2 + $0x100] ss:$8 sps:$4 sm:$0xff]   ;;  %v2521_v16 = vld [vmem:[#allocation2 + $0x114] ss:$8 sps:$4 sm:$0xff]   ;;  %v2880_v17 = vmov 1.0|1.0  }
  0x51   :  { %580 = vmatprep.subr.bf16.mxu0 %v2450_v28  ;;  %621 = vmatprep.subr.bf16.mxu1 %v2452_v29  ;;  %v2976_v8 = vadd.s32 128, %v2973_v7  ;;  %v2979_v10 = vadd.s32 384, %v2973_v7  ;;  %v2982_v11 = vadd.s32 256, %v2973_v7  ;;  %v2516_v18 = vld [vmem:[#allocation2 + $0x10] ss:$8 sps:$4 sm:$0xff]  }
  0x52   :  { %v2519_v19 = vld [vmem:[#allocation2 + $0x110] ss:$8 sps:$4 sm:$0xff]   ;;  %v2524_v20 = vld [vmem:[#allocation2 + $0x24] ss:$8 sps:$4 sm:$0xff]   ;;  %v2522_v23 = vld [vmem:[#allocation2 + $0x20] ss:$8 sps:$4 sm:$0xff]  }
  0x53   :  { %v2527_v22 = vld [vmem:[#allocation2 + $0x124] ss:$8 sps:$4 sm:$0xff]   ;;  %v2525_v24 = vld [vmem:[#allocation2 + $0x120] ss:$8 sps:$4 sm:$0xff]   ;;  %v2530_v25 = vld [vmem:[#allocation2 + $0x34] ss:$8 sps:$4 sm:$0xff]  }
  0x54   :  { %581 = vmatpush1.bf16.msra.mxu0 %v2454_v30  ;;  %622 = vmatpush1.bf16.msra.mxu1 %v2455_v31  ;;  %v2528_v26 = vld [vmem:[#allocation2 + $0x30] ss:$8 sps:$4 sm:$0xff]   ;;  %v2533_v27 = vld [vmem:[#allocation2 + $0x134] ss:$8 sps:$4 sm:$0xff]   ;;  %v2536_v29 = vld [vmem:[#allocation2 + $0x44] ss:$8 sps:$4 sm:$0xff]  }
  0x55   :  { %582 = vmatprep.subr.bf16.mxu0 %v2456_v32  ;;  %623 = vmatprep.subr.bf16.mxu1 %v2458_v33  ;;  %v2531_v28 = vld [vmem:[#allocation2 + $0x130] ss:$8 sps:$4 sm:$0xff]   ;;  %v2539_v30 = vld [vmem:[#allocation2 + $0x144] ss:$8 sps:$4 sm:$0xff]   ;;  %v2534_v31 = vld [vmem:[#allocation2 + $0x40] ss:$8 sps:$4 sm:$0xff]  }
  0x56   :  { %v2537_v32 = vld [vmem:[#allocation2 + $0x140] ss:$8 sps:$4 sm:$0xff]   ;;  %v2542_v33 = vld [vmem:[#allocation2 + $0x54] ss:$8 sps:$4 sm:$0xff]  }
  0x58   :  { %583 = vmatpush1.bf16.msra.mxu0 %v2460_v34  ;;  %624 = vmatpush1.bf16.msra.mxu1 %v2461_v35  ;;  %v2545_v34 = vld [vmem:[#allocation2 + $0x154] ss:$8 sps:$4 sm:$0xff]   ;;  %v2540_v35 = vld [vmem:[#allocation2 + $0x50] ss:$8 sps:$4 sm:$0xff]  }
  0x59   :  { %584 = vmatprep.subr.bf16.mxu0 %v2462_v36  ;;  %625 = vmatprep.subr.bf16.mxu1 %v2464_v37  ;;  %v2543_v36 = vld [vmem:[#allocation2 + $0x150] ss:$8 sps:$4 sm:$0xff]   ;;  %v2548_v37 = vld [vmem:[#allocation2 + $0x64] ss:$8 sps:$4 sm:$0xff]  }
  0x5c   :  { %585 = vmatpush1.bf16.msra.mxu0 %v2466_v38  ;;  %626 = vmatpush1.bf16.msra.mxu1 %v2467_v39  ;;  %v2551_v38 = vld [vmem:[#allocation2 + $0x164] ss:$8 sps:$4 sm:$0xff]   ;;  %v2546_v39 = vld [vmem:[#allocation2 + $0x60] ss:$8 sps:$4 sm:$0xff]  }
  0x5d   :  { %586 = vmatprep.subr.bf16.mxu0 %v2468_v40  ;;  %627 = vmatprep.subr.bf16.mxu1 %v2470_v41  ;;  %v2549_v40 = vld [vmem:[#allocation2 + $0x160] ss:$8 sps:$4 sm:$0xff]   ;;  %v2554_v41 = vld [vmem:[#allocation2 + $0x74] ss:$8 sps:$4 sm:$0xff]  }
  0x60   :  { %587 = vmatpush1.bf16.msra.mxu0 %v2472_v42  ;;  %628 = vmatpush1.bf16.msra.mxu1 %v2473_v43  ;;  %v2557_v42 = vld [vmem:[#allocation2 + $0x174] ss:$8 sps:$4 sm:$0xff]   ;;  %v2552_v43 = vld [vmem:[#allocation2 + $0x70] ss:$8 sps:$4 sm:$0xff]  }
  0x61   :  { %588 = vmatprep.subr.bf16.mxu0 %v2474_v44  ;;  %629 = vmatprep.subr.bf16.mxu1 %v2476_v45  ;;  %v2555_v44 = vld [vmem:[#allocation2 + $0x170] ss:$8 sps:$4 sm:$0xff]   ;;  %v2560_v45 = vld [vmem:[#allocation2 + $0x84] ss:$8 sps:$4 sm:$0xff]  }
  0x64   :  { %589 = vmatpush1.bf16.msra.mxu0 %v2478_v46  ;;  %630 = vmatpush1.bf16.msra.mxu1 %v2479_v47  ;;  %v2563_v46 = vld [vmem:[#allocation2 + $0x184] ss:$8 sps:$4 sm:$0xff]   ;;  %v2558_v47 = vld [vmem:[#allocation2 + $0x80] ss:$8 sps:$4 sm:$0xff]  }
  0x65   :  { %590 = vmatprep.subr.bf16.mxu0 %v2480_v48  ;;  %631 = vmatprep.subr.bf16.mxu1 %v2482_v49  ;;  %v2561_v48 = vld [vmem:[#allocation2 + $0x180] ss:$8 sps:$4 sm:$0xff]   ;;  %v2566_v49 = vld [vmem:[#allocation2 + $0x94] ss:$8 sps:$4 sm:$0xff]  }
  0x68   :  { %591 = vmatpush1.bf16.msra.mxu0 %v2484_v50  ;;  %632 = vmatpush1.bf16.msra.mxu1 %v2485_v51  ;;  %v2569_v50 = vld [vmem:[#allocation2 + $0x194] ss:$8 sps:$4 sm:$0xff]   ;;  %v2564_v51 = vld [vmem:[#allocation2 + $0x90] ss:$8 sps:$4 sm:$0xff]  }
  0x69   :  { %592 = vmatprep.subr.bf16.mxu0 %v2486_v52  ;;  %633 = vmatprep.subr.bf16.mxu1 %v2488_v53  ;;  %v2567_v52 = vld [vmem:[#allocation2 + $0x190] ss:$8 sps:$4 sm:$0xff]   ;;  %v2572_v53 = vld [vmem:[#allocation2 + $0xa4] ss:$8 sps:$4 sm:$0xff]  }
  0x6c   :  { %593 = vmatpush1.bf16.msra.mxu0 %v2490_v54  ;;  %634 = vmatpush1.bf16.msra.mxu1 %v2491_v55  ;;  %v2575_v54 = vld [vmem:[#allocation2 + $0x1a4] ss:$8 sps:$4 sm:$0xff]   ;;  %v2570_v55 = vld [vmem:[#allocation2 + $0xa0] ss:$8 sps:$4 sm:$0xff]  }
  0x6d   :  { %594 = vmatprep.subr.bf16.mxu0 %v2492_v56  ;;  %635 = vmatprep.subr.bf16.mxu1 %v2494_v57  ;;  %v2573_v56 = vld [vmem:[#allocation2 + $0x1a0] ss:$8 sps:$4 sm:$0xff]   ;;  %v2578_v57 = vld [vmem:[#allocation2 + $0xb4] ss:$8 sps:$4 sm:$0xff]  }
  0x70   :  { %595 = vmatpush1.bf16.msra.mxu0 %v2496_v58  ;;  %636 = vmatpush1.bf16.msra.mxu1 %v2497_v59  ;;  %v2581_v58 = vld [vmem:[#allocation2 + $0x1b4] ss:$8 sps:$4 sm:$0xff]   ;;  %v2576_v59 = vld [vmem:[#allocation2 + $0xb0] ss:$8 sps:$4 sm:$0xff]  }
  0x71   :  { %596 = vmatprep.subr.bf16.mxu0 %v2498_v60  ;;  %637 = vmatprep.subr.bf16.mxu1 %v2500_v61  ;;  %v2579_v60 = vld [vmem:[#allocation2 + $0x1b0] ss:$8 sps:$4 sm:$0xff]   ;;  %v2584_v61 = vld [vmem:[#allocation2 + $0xc4] ss:$8 sps:$4 sm:$0xff]  }
  0x74   :  { %597 = vmatpush1.bf16.msra.mxu0 %v2502_v62  ;;  %638 = vmatpush1.bf16.msra.mxu1 %v2503_v63  ;;  %v2587_v62 = vld [vmem:[#allocation2 + $0x1c4] ss:$8 sps:$4 sm:$0xff]   ;;  %v2582_v63 = vld [vmem:[#allocation2 + $0xc0] ss:$8 sps:$4 sm:$0xff]  }
  0x75   :  { %598 = vmatprep.subr.bf16.mxu0 %v2504_v0  ;;  %639 = vmatprep.subr.bf16.mxu1 %v2506_v1  ;;  %v2585_v0 = vld [vmem:[#allocation2 + $0x1c0] ss:$8 sps:$4 sm:$0xff]   ;;  %v2590_v1 = vld [vmem:[#allocation2 + $0xd4] ss:$8 sps:$4 sm:$0xff]  }
  0x78   :  { %599 = vmatpush1.bf16.msra.mxu0 %v2508_v2  ;;  %640 = vmatpush1.bf16.msra.mxu1 %v2509_v3  ;;  %v2593_v2 = vld [vmem:[#allocation2 + $0x1d4] ss:$8 sps:$4 sm:$0xff]   ;;  %v2588_v3 = vld [vmem:[#allocation2 + $0xd0] ss:$8 sps:$4 sm:$0xff]  }
  0x79   :  { %970 = vmatprep.subr.bf16.mxu0 %v2512_v4  ;;  %1011 = vmatprep.subr.bf16.mxu1 %v2515_v5  ;;  %v2591_v4 = vld [vmem:[#allocation2 + $0x1d0] ss:$8 sps:$4 sm:$0xff]   ;;  %v2596_v5 = vld [vmem:[#allocation2 + $0xe4] ss:$8 sps:$4 sm:$0xff]  }
  0xb9   :  { %v166_v12 = vpop.permute.xlu0 %165 }
  0xba   :  { %vm168_vm0 = vcmp.eq.s32.totalorder %v166_v12, %v2976_v8  ;;  %vm170_vm1 = vcmp.eq.s32.totalorder %v166_v12, %v2979_v10  ;;  %vm167_vm2 = vcmp.eq.s32.totalorder %v166_v12, %v2973_v7  ;;  %vm169_vm4 = vcmp.eq.s32.totalorder %v166_v12, %v2982_v11  ;;  %v2599_v12 = vld [vmem:[#allocation2 + $0x1e4] ss:$8 sps:$4 sm:$0xff]  }
  0xbb   :  { %vm2169_vm3 = vmpackc.low %vm168_vm0, %vm168_vm0 }
  0xbc   :  { %2170 = vmatprep.mubr.msk.bf16.mxu0 %vm2169_vm3, %v2880_v17  ;;  %vm2173_vm5 = vmpackc.low %vm170_vm1, %vm170_vm1 }
  0xbd   :  { %2174 = vmatprep.mubr.msk.bf16.mxu1 %vm2173_vm5, %v2880_v17  ;;  %vm2171_vm6 = vmpackc.low %vm167_vm2, %vm167_vm2 }
  0xbe   :  { %2172 = vmatmul.mubr.msk.bf16.vlgmr.msra.gmra.mrb[0].mxu0 %vm2171_vm6, %v2880_v17  ;;  %vm2175_vm7 = vmpackc.low %vm169_vm4, %vm169_vm4  ;;  %v2991_v21 = vpop.permute.xlu0 %82 }
  0xbf   :  { %2176 = vmatmul.mubr.msk.bf16.vlgmr.msra.gmra.mrb[0].mxu1 %vm2175_vm7, %v2880_v17  ;;  %971 = vmatpush1.bf16.msra.mxu0 %v2510_v13  ;;  %vm85_vm8 = vcmp.eq.s32.totalorder %v2991_v21, %v2976_v8  ;;  %vm87_vm10 = vcmp.eq.s32.totalorder %v2991_v21, %v2979_v10  ;;  %v2594_v13 = vld [vmem:[#allocation2 + $0xe0] ss:$8 sps:$4 sm:$0xff]   ;;  %vm84_vm12 = vcmp.eq.s32.totalorder %v2991_v21, %v2973_v7 }
  0xc0   :  { %1012 = vmatpush1.bf16.msra.mxu1 %v2513_v14  ;;  %972 = vmatprep.subr.bf16.mxu0 %v2518_v15  ;;  %vm2241_vm9 = vmpackc.low %vm85_vm8, %vm85_vm8  ;;  %v2597_v14 = vld [vmem:[#allocation2 + $0x1e0] ss:$8 sps:$4 sm:$0xff]   ;;  %v2602_v15 = vld [vmem:[#allocation2 + $0xf4] ss:$8 sps:$4 sm:$0xff]   ;;  %vm86_vm13 = vcmp.eq.s32.totalorder %v2991_v21, %v2982_v11 }
  0xc1   :  { %1013 = vmatprep.subr.bf16.mxu1 %v2521_v16  ;;  %2242 = vmatprep.mubr.msk.bf16.mxu0 %vm2241_vm9, %v2880_v17  ;;  %vm2245_vm11 = vmpackc.low %vm87_vm10, %vm87_vm10  ;;  %v2605_v16 = vld [vmem:[#allocation2 + $0x1f4] ss:$8 sps:$4 sm:$0xff]   ;;  %v2612_v21 = vld [vmem:[#allocation2 + $0x410] ss:$8 sps:$4 sm:$0xff]  }
  0xc2   :  { %2246 = vmatprep.mubr.msk.bf16.mxu1 %vm2245_vm11, %v2880_v17  ;;  %vm2243_vm14 = vmpackc.low %vm84_vm12, %vm84_vm12 }
  0xc3   :  { %973 = vmatpush1.bf16.msra.mxu0 %v2516_v18  ;;  %v2600_v18 = vld [vmem:[#allocation2 + $0xf0] ss:$8 sps:$4 sm:$0xff]   ;;  %vm2247_vm0 = vmpackc.low %vm86_vm13, %vm86_vm13 }
  0xc4   :  { %1014 = vmatpush1.bf16.msra.mxu1 %v2519_v19  ;;  %974 = vmatprep.subr.bf16.mxu0 %v2524_v20  ;;  %v2603_v19 = vld [vmem:[#allocation2 + $0x1f0] ss:$8 sps:$4 sm:$0xff]   ;;  %v2608_v20 = vld [vmem:[#allocation2 + $0x404] ss:$8 sps:$4 sm:$0xff]  }
  0xc5   :  { %1015 = vmatprep.subr.bf16.mxu1 %v2527_v22  ;;  %v3002_v22 = vpop.permute.xlu1 %1053 }
  0xc6   :  { %vm1056_vm15 = vcmp.eq.s32.totalorder %v3002_v22, %v2976_v8  ;;  %vm1058_vm1 = vcmp.eq.s32.totalorder %v3002_v22, %v2979_v10  ;;  %v2615_v8 = vld [vmem:[#allocation2 + $0x510] ss:$8 sps:$4 sm:$0xff]   ;;  %v2618_v10 = vld [vmem:[#allocation2 + $0x420] ss:$8 sps:$4 sm:$0xff]   ;;  %vm1055_vm4 = vcmp.eq.s32.totalorder %v3002_v22, %v2973_v7  ;;  %vm1057_vm5 = vcmp.eq.s32.totalorder %v3002_v22, %v2982_v11 }
  0xc7   :  { %975 = vmatpush1.bf16.msra.mxu0 %v2522_v23  ;;  %v2611_v23 = vld [vmem:[#allocation2 + $0x504] ss:$8 sps:$4 sm:$0xff]   ;;  %vm2317_vm2 = vmpackc.low %vm1056_vm15, %vm1056_vm15 }
  0xc8   :  { %1016 = vmatpush1.bf16.msra.mxu1 %v2525_v24  ;;  %976 = vmatprep.subr.bf16.mxu0 %v2530_v25  ;;  %v2606_v24 = vld [vmem:[#allocation2 + $0x400] ss:$8 sps:$4 sm:$0xff]   ;;  %vm2321_vm3 = vmpackc.low %vm1058_vm1, %vm1058_vm1 }
  0xc9   :  { %1017 = vmatprep.subr.bf16.mxu1 %v2533_v27  ;;  %v2609_v25 = vld [vmem:[#allocation2 + $0x500] ss:$8 sps:$4 sm:$0xff]   ;;  %v2617_v27 = vld [vmem:[#allocation2 + $0x514] ss:$8 sps:$4 sm:$0xff]   ;;  %vm2319_vm6 = vmpackc.low %vm1055_vm4, %vm1055_vm4 }
  0xca   :  { %vm2323_vm7 = vmpackc.low %vm1057_vm5, %vm1057_vm5 }
  0xcb   :  { %977 = vmatpush1.bf16.msra.mxu0 %v2528_v26  ;;  %v2614_v26 = vld [vmem:[#allocation2 + $0x414] ss:$8 sps:$4 sm:$0xff]  }
  0xcc   :  { %1018 = vmatpush1.bf16.msra.mxu1 %v2531_v28  ;;  %978 = vmatprep.subr.bf16.mxu0 %v2536_v29  ;;  %v2620_v28 = vld [vmem:[#allocation2 + $0x424] ss:$8 sps:$4 sm:$0xff]  }
  0xcd   :  { %1019 = vmatprep.subr.bf16.mxu1 %v2539_v30  ;;  %v2623_v29 = vld [vmem:[#allocation2 + $0x524] ss:$8 sps:$4 sm:$0xff]   ;;  %v2621_v30 = vld [vmem:[#allocation2 + $0x520] ss:$8 sps:$4 sm:$0xff]  }
  0xcf   :  { %979 = vmatpush1.bf16.msra.mxu0 %v2534_v31  ;;  %v2626_v31 = vld [vmem:[#allocation2 + $0x434] ss:$8 sps:$4 sm:$0xff]  }
  0xd0   :  { %1020 = vmatpush1.bf16.msra.mxu1 %v2537_v32  ;;  %980 = vmatprep.subr.bf16.mxu0 %v2542_v33  ;;  %v2629_v32 = vld [vmem:[#allocation2 + $0x534] ss:$8 sps:$4 sm:$0xff]   ;;  %v2624_v33 = vld [vmem:[#allocation2 + $0x430] ss:$8 sps:$4 sm:$0xff]  }
  0xd1   :  { %1021 = vmatprep.subr.bf16.mxu1 %v2545_v34  ;;  %v2627_v34 = vld [vmem:[#allocation2 + $0x530] ss:$8 sps:$4 sm:$0xff]  }
  0xd3   :  { %981 = vmatpush1.bf16.msra.mxu0 %v2540_v35  ;;  %v2632_v35 = vld [vmem:[#allocation2 + $0x444] ss:$8 sps:$4 sm:$0xff]  }
  0xd4   :  { %1022 = vmatpush1.bf16.msra.mxu1 %v2543_v36  ;;  %982 = vmatprep.subr.bf16.mxu0 %v2548_v37  ;;  %v2635_v36 = vld [vmem:[#allocation2 + $0x544] ss:$8 sps:$4 sm:$0xff]   ;;  %v2630_v37 = vld [vmem:[#allocation2 + $0x440] ss:$8 sps:$4 sm:$0xff]  }
  0xd5   :  { %1023 = vmatprep.subr.bf16.mxu1 %v2551_v38  ;;  %v2633_v38 = vld [vmem:[#allocation2 + $0x540] ss:$8 sps:$4 sm:$0xff]  }
  0xd7   :  { %983 = vmatpush1.bf16.msra.mxu0 %v2546_v39  ;;  %v2638_v39 = vld [vmem:[#allocation2 + $0x454] ss:$8 sps:$4 sm:$0xff]  }
  0xd8   :  { %1024 = vmatpush1.bf16.msra.mxu1 %v2549_v40  ;;  %984 = vmatprep.subr.bf16.mxu0 %v2554_v41  ;;  %v2641_v40 = vld [vmem:[#allocation2 + $0x554] ss:$8 sps:$4 sm:$0xff]   ;;  %v2636_v41 = vld [vmem:[#allocation2 + $0x450] ss:$8 sps:$4 sm:$0xff]  }
  0xd9   :  { %1025 = vmatprep.subr.bf16.mxu1 %v2557_v42  ;;  %v2639_v42 = vld [vmem:[#allocation2 + $0x550] ss:$8 sps:$4 sm:$0xff]  }
  0xdb   :  { %985 = vmatpush1.bf16.msra.mxu0 %v2552_v43  ;;  %v2644_v43 = vld [vmem:[#allocation2 + $0x464] ss:$8 sps:$4 sm:$0xff]  }
  0xdc   :  { %1026 = vmatpush1.bf16.msra.mxu1 %v2555_v44  ;;  %986 = vmatprep.subr.bf16.mxu0 %v2560_v45  ;;  %v2647_v44 = vld [vmem:[#allocation2 + $0x564] ss:$8 sps:$4 sm:$0xff]   ;;  %v2642_v45 = vld [vmem:[#allocation2 + $0x460] ss:$8 sps:$4 sm:$0xff]  }
  0xdd   :  { %1027 = vmatprep.subr.bf16.mxu1 %v2563_v46  ;;  %v2645_v46 = vld [vmem:[#allocation2 + $0x560] ss:$8 sps:$4 sm:$0xff]  }
  0xdf   :  { %987 = vmatpush1.bf16.msra.mxu0 %v2558_v47  ;;  %v2650_v47 = vld [vmem:[#allocation2 + $0x474] ss:$8 sps:$4 sm:$0xff]  }
  0xe0   :  { %1028 = vmatpush1.bf16.msra.mxu1 %v2561_v48  ;;  %988 = vmatprep.subr.bf16.mxu0 %v2566_v49  ;;  %v2653_v48 = vld [vmem:[#allocation2 + $0x574] ss:$8 sps:$4 sm:$0xff]   ;;  %v2648_v49 = vld [vmem:[#allocation2 + $0x470] ss:$8 sps:$4 sm:$0xff]  }
  0xe1   :  { %1029 = vmatprep.subr.bf16.mxu1 %v2569_v50  ;;  %v2651_v50 = vld [vmem:[#allocation2 + $0x570] ss:$8 sps:$4 sm:$0xff]  }
  0xe3   :  { %989 = vmatpush1.bf16.msra.mxu0 %v2564_v51  ;;  %v2656_v51 = vld [vmem:[#allocation2 + $0x484] ss:$8 sps:$4 sm:$0xff]  }
  0xe4   :  { %1030 = vmatpush1.bf16.msra.mxu1 %v2567_v52  ;;  %990 = vmatprep.subr.bf16.mxu0 %v2572_v53  ;;  %v2659_v52 = vld [vmem:[#allocation2 + $0x584] ss:$8 sps:$4 sm:$0xff]   ;;  %v2654_v53 = vld [vmem:[#allocation2 + $0x480] ss:$8 sps:$4 sm:$0xff]  }
  0xe5   :  { %1031 = vmatprep.subr.bf16.mxu1 %v2575_v54  ;;  %v2657_v54 = vld [vmem:[#allocation2 + $0x580] ss:$8 sps:$4 sm:$0xff]  }
  0xe7   :  { %991 = vmatpush1.bf16.msra.mxu0 %v2570_v55  ;;  %v2662_v55 = vld [vmem:[#allocation2 + $0x494] ss:$8 sps:$4 sm:$0xff]  }
  0xe8   :  { %1032 = vmatpush1.bf16.msra.mxu1 %v2573_v56  ;;  %992 = vmatprep.subr.bf16.mxu0 %v2578_v57  ;;  %v2665_v56 = vld [vmem:[#allocation2 + $0x594] ss:$8 sps:$4 sm:$0xff]   ;;  %v2660_v57 = vld [vmem:[#allocation2 + $0x490] ss:$8 sps:$4 sm:$0xff]  }
  0xe9   :  { %1033 = vmatprep.subr.bf16.mxu1 %v2581_v58  ;;  %v2663_v58 = vld [vmem:[#allocation2 + $0x590] ss:$8 sps:$4 sm:$0xff]  }
  0xeb   :  { %993 = vmatpush1.bf16.msra.mxu0 %v2576_v59  ;;  %v2668_v59 = vld [vmem:[#allocation2 + $0x4a4] ss:$8 sps:$4 sm:$0xff]  }
  0xec   :  { %1034 = vmatpush1.bf16.msra.mxu1 %v2579_v60  ;;  %994 = vmatprep.subr.bf16.mxu0 %v2584_v61  ;;  %v2671_v60 = vld [vmem:[#allocation2 + $0x5a4] ss:$8 sps:$4 sm:$0xff]   ;;  %v2666_v61 = vld [vmem:[#allocation2 + $0x4a0] ss:$8 sps:$4 sm:$0xff]  }
  0xed   :  { %1035 = vmatprep.subr.bf16.mxu1 %v2587_v62  ;;  %v2669_v62 = vld [vmem:[#allocation2 + $0x5a0] ss:$8 sps:$4 sm:$0xff]  }
  0xef   :  { %995 = vmatpush1.bf16.msra.mxu0 %v2582_v63  ;;  %v2674_v63 = vld [vmem:[#allocation2 + $0x4b4] ss:$8 sps:$4 sm:$0xff]  }
  0xf0   :  { %1036 = vmatpush1.bf16.msra.mxu1 %v2585_v0  ;;  %996 = vmatprep.subr.bf16.mxu0 %v2590_v1  ;;  %v2677_v0 = vld [vmem:[#allocation2 + $0x5b4] ss:$8 sps:$4 sm:$0xff]   ;;  %v2672_v1 = vld [vmem:[#allocation2 + $0x4b0] ss:$8 sps:$4 sm:$0xff]  }
  0xf1   :  { %1037 = vmatprep.subr.bf16.mxu1 %v2593_v2  ;;  %v2675_v2 = vld [vmem:[#allocation2 + $0x5b0] ss:$8 sps:$4 sm:$0xff]  }
  0xf3   :  { %997 = vmatpush1.bf16.msra.mxu0 %v2588_v3  ;;  %v2680_v3 = vld [vmem:[#allocation2 + $0x4c4] ss:$8 sps:$4 sm:$0xff]  }
  0xf4   :  { %1038 = vmatpush1.bf16.msra.mxu1 %v2591_v4  ;;  %998 = vmatprep.subr.bf16.mxu0 %v2596_v5  ;;  %v2683_v4 = vld [vmem:[#allocation2 + $0x5c4] ss:$8 sps:$4 sm:$0xff]   ;;  %v2678_v5 = vld [vmem:[#allocation2 + $0x4c0] ss:$8 sps:$4 sm:$0xff]  }
  0xf5   :  { %1039 = vmatprep.subr.bf16.mxu1 %v2599_v12  ;;  %v2681_v12 = vld [vmem:[#allocation2 + $0x5c0] ss:$8 sps:$4 sm:$0xff]  }
  0xf7   :  { %999 = vmatpush1.bf16.msra.mxu0 %v2594_v13  ;;  %v2686_v13 = vld [vmem:[#allocation2 + $0x4d4] ss:$8 sps:$4 sm:$0xff]  }
  0xf8   :  { %1040 = vmatpush1.bf16.msra.mxu1 %v2597_v14  ;;  %1000 = vmatprep.subr.bf16.mxu0 %v2602_v15  ;;  %v2689_v14 = vld [vmem:[#allocation2 + $0x5d4] ss:$8 sps:$4 sm:$0xff]   ;;  %v2684_v15 = vld [vmem:[#allocation2 + $0x4d0] ss:$8 sps:$4 sm:$0xff]  }
  0xf9   :  { %1041 = vmatprep.subr.bf16.mxu1 %v2605_v16  ;;  %v2687_v16 = vld [vmem:[#allocation2 + $0x5d0] ss:$8 sps:$4 sm:$0xff]  }
  0xfb   :  { %1001 = vmatpush1.bf16.msra.mxu0 %v2600_v18  ;;  %v2692_v18 = vld [vmem:[#allocation2 + $0x4e4] ss:$8 sps:$4 sm:$0xff]  }
  0xfc   :  { %1042 = vmatpush1.bf16.msra.mxu1 %v2603_v19  ;;  %1456 = vmatprep.subr.bf16.mxu0 %v2608_v20  ;;  %v2695_v19 = vld [vmem:[#allocation2 + $0x5e4] ss:$8 sps:$4 sm:$0xff]   ;;  %v2690_v20 = vld [vmem:[#allocation2 + $0x4e0] ss:$8 sps:$4 sm:$0xff]  }
  0xfd   :  { %1497 = vmatprep.subr.bf16.mxu1 %v2611_v23  ;;  %v2693_v23 = vld [vmem:[#allocation2 + $0x5e0] ss:$8 sps:$4 sm:$0xff]  }
  0xfe   :  { %2244 = vmatmul.mubr.msk.bf16.vlgmr.msra.gmra.mrb[4].mxu0 %vm2243_vm14, %v2880_v17 }
  0xff   :  { %2248 = vmatmul.mubr.msk.bf16.vlgmr.msra.gmra.mrb[4].mxu1 %vm2247_vm0, %v2880_v17  ;;  %1457 = vmatpush1.bf16.msra.mxu0 %v2606_v24  ;;  %v2698_v24 = vld [vmem:[#allocation2 + $0x4f4] ss:$8 sps:$4 sm:$0xff]  }
 0x100   :  { %1498 = vmatpush1.bf16.msra.mxu1 %v2609_v25  ;;  %1458 = vmatprep.subr.bf16.mxu0 %v2614_v26  ;;  %v2701_v25 = vld [vmem:[#allocation2 + $0x5f4] ss:$8 sps:$4 sm:$0xff]   ;;  %v2696_v26 = vld [vmem:[#allocation2 + $0x4f0] ss:$8 sps:$4 sm:$0xff]  }
 0x101   :  { %1499 = vmatprep.subr.bf16.mxu1 %v2617_v27  ;;  %2318 = vmatprep.mubr.msk.bf16.mxu0 %vm2317_vm2, %v2880_v17  ;;  %v2699_v27 = vld [vmem:[#allocation2 + $0x5f0] ss:$8 sps:$4 sm:$0xff]  }
 0x102   :  { %2322 = vmatprep.mubr.msk.bf16.mxu1 %vm2321_vm3, %v2880_v17 }
 0x103   :  { %1459 = vmatpush1.bf16.msra.mxu0 %v2612_v21 }
 0x104   :  { %1500 = vmatpush1.bf16.msra.mxu1 %v2615_v8  ;;  %1460 = vmatprep.subr.bf16.mxu0 %v2620_v28 }
 0x105   :  { %1501 = vmatprep.subr.bf16.mxu1 %v2623_v29 }
 0x107   :  { %1461 = vmatpush1.bf16.msra.mxu0 %v2618_v10 }
 0x108   :  { %1502 = vmatpush1.bf16.msra.mxu1 %v2621_v30  ;;  %1462 = vmatprep.subr.bf16.mxu0 %v2626_v31 }
 0x109   :  { %1503 = vmatprep.subr.bf16.mxu1 %v2629_v32  ;;  %v2702_v32 = vld [vmem:[#allocation5 + $0x40] sm:$0xff]  }
 0x10b   :  { %1463 = vmatpush1.bf16.msra.mxu0 %v2624_v33  ;;  %v2703_v33 = vld [vmem:[#allocation5] sm:$0xff]  }
 0x10c   :  { %1504 = vmatpush1.bf16.msra.mxu1 %v2627_v34  ;;  %1464 = vmatprep.subr.bf16.mxu0 %v2632_v35 }
 0x10d   :  { %1505 = vmatprep.subr.bf16.mxu1 %v2635_v36 }
 0x10f   :  { %1465 = vmatpush1.bf16.msra.mxu0 %v2630_v37 }
 0x110   :  { %1506 = vmatpush1.bf16.msra.mxu1 %v2633_v38  ;;  %1466 = vmatprep.subr.bf16.mxu0 %v2638_v39 }
 0x111   :  { %1507 = vmatprep.subr.bf16.mxu1 %v2641_v40 }
 0x113   :  { %1467 = vmatpush1.bf16.msra.mxu0 %v2636_v41 }
 0x114   :  { %1508 = vmatpush1.bf16.msra.mxu1 %v2639_v42  ;;  %1468 = vmatprep.subr.bf16.mxu0 %v2644_v43 }
 0x115   :  { %1509 = vmatprep.subr.bf16.mxu1 %v2647_v44 }
 0x117   :  { %1469 = vmatpush1.bf16.msra.mxu0 %v2642_v45  ;;  %v3022_v45 = vshrl.u32 %v75_v6, 7 }
 0x118   :  { %1510 = vmatpush1.bf16.msra.mxu1 %v2645_v46  ;;  %1470 = vmatprep.subr.bf16.mxu0 %v2650_v47  ;;  %v1540_v47 = vld [vmem:[%s3082_s2] sm:$0x3] }
 0x119   :  { %1511 = vmatprep.subr.bf16.mxu1 %v2653_v48  ;;  %v3025_v46 = vsub.s32 0, %v3022_v45  ;;  %v3031_v48 = vsub.s32 1, %v3022_v45 }
 0x11b   :  { %1471 = vmatpush1.bf16.msra.mxu0 %v2648_v49 }
 0x11c   :  { %1512 = vmatpush1.bf16.msra.mxu1 %v2651_v50  ;;  %1472 = vmatprep.subr.bf16.mxu0 %v2656_v51 }
 0x11d   :  { %1513 = vmatprep.subr.bf16.mxu1 %v2659_v52 }
 0x11f   :  { %1473 = vmatpush1.bf16.msra.mxu0 %v2654_v53  ;;  %v1545_v53 = vrot.slane %v1540_v47, %v3025_v46 }
 0x120   :  { %1514 = vmatpush1.bf16.msra.mxu1 %v2657_v54  ;;  %1474 = vmatprep.subr.bf16.mxu0 %v2662_v55 }
 0x121   :  { %1515 = vmatprep.subr.bf16.mxu1 %v2665_v56  ;;  %v1549_v56 = vrot.slane %v1540_v47, %v3031_v48 }
 0x123   :  { %1475 = vmatpush1.bf16.msra.mxu0 %v2660_v57 }
 0x124   :  { %1516 = vmatpush1.bf16.msra.mxu1 %v2663_v58  ;;  %1476 = vmatprep.subr.bf16.mxu0 %v2668_v59 }
 0x125   :  { %1517 = vmatprep.subr.bf16.mxu1 %v2671_v60 }
 0x127   :  { %1477 = vmatpush1.bf16.msra.mxu0 %v2666_v61 }
 0x128   :  { %1518 = vmatpush1.bf16.msra.mxu1 %v2669_v62  ;;  %1478 = vmatprep.subr.bf16.mxu0 %v2674_v63 }
 0x129   :  { %1519 = vmatprep.subr.bf16.mxu1 %v2677_v0 }
 0x12b   :  { %1479 = vmatpush1.bf16.msra.mxu0 %v2672_v1 }
 0x12c   :  { %1520 = vmatpush1.bf16.msra.mxu1 %v2675_v2  ;;  %1480 = vmatprep.subr.bf16.mxu0 %v2680_v3 }
 0x12d   :  { %1521 = vmatprep.subr.bf16.mxu1 %v2683_v4 }
 0x12f   :  { %1481 = vmatpush1.bf16.msra.mxu0 %v2678_v5 }
 0x130   :  { %1522 = vmatpush1.bf16.msra.mxu1 %v2681_v12  ;;  %1482 = vmatprep.subr.bf16.mxu0 %v2686_v13  ;;  %v2704_v12 = vld [vmem:[#allocation5 + $0x48] sm:$0xff]  }
 0x131   :  { %1523 = vmatprep.subr.bf16.mxu1 %v2689_v14  ;;  %v2705_v13 = vld [vmem:[#allocation5 + $0x8] sm:$0xff]   ;;  %v2706_v14 = vld [vmem:[#allocation5 + $0x50] sm:$0xff]  }
 0x133   :  { %1483 = vmatpush1.bf16.msra.mxu0 %v2684_v15  ;;  %v2707_v15 = vld [vmem:[#allocation5 + $0x10] sm:$0xff]  }
 0x134   :  { %1524 = vmatpush1.bf16.msra.mxu1 %v2687_v16  ;;  %1484 = vmatprep.subr.bf16.mxu0 %v2692_v18  ;;  %v2708_v16 = vld [vmem:[#allocation5 + $0x58] sm:$0xff]  }
 0x135   :  { %1525 = vmatprep.subr.bf16.mxu1 %v2695_v19  ;;  %v2709_v18 = vld [vmem:[#allocation5 + $0x18] sm:$0xff]   ;;  %v2710_v19 = vld [vmem:[#allocation5 + $0x60] sm:$0xff]  }
 0x137   :  { %1485 = vmatpush1.bf16.msra.mxu0 %v2690_v20  ;;  %v2711_v20 = vld [vmem:[#allocation5 + $0x20] sm:$0xff]  }
 0x138   :  { %1526 = vmatpush1.bf16.msra.mxu1 %v2693_v23  ;;  %1486 = vmatprep.subr.bf16.mxu0 %v2698_v24  ;;  %v2712_v23 = vld [vmem:[#allocation5 + $0x68] sm:$0xff]  }
 0x139   :  { %1527 = vmatprep.subr.bf16.mxu1 %v2701_v25  ;;  %v2713_v24 = vld [vmem:[#allocation5 + $0x28] sm:$0xff]   ;;  %v2714_v25 = vld [vmem:[#allocation5 + $0x70] sm:$0xff]  }
 0x13b   :  { %1487 = vmatpush1.bf16.msra.mxu0 %v2696_v26  ;;  %v2715_v26 = vld [vmem:[#allocation5 + $0x30] sm:$0xff]  }
 0x13c   :  { %1528 = vmatpush1.bf16.msra.mxu1 %v2699_v27  ;;  %2374 = vmatprep.subr.bf16.mxu0 %v2702_v32  ;;  %v2716_v27 = vld [vmem:[#allocation5 + $0x78] sm:$0xff]  }
 0x13e   :  { %2320 = vmatmul.mubr.msk.bf16.vlgmr.msra.gmra.mrb[8].mxu0 %vm2319_vm6, %v2880_v17 }
 0x13f   :  { %2324 = vmatmul.mubr.msk.bf16.vlgmr.msra.gmra.mrb[8].mxu1 %vm2323_vm7, %v2880_v17  ;;  %2375 = vmatpush3.bf16.msra.mxu0 %v2703_v33 }
 0x140   :  { %2027 = vmatprep.mubr.bf16.mxu1 %v2879_v9  ;;  %2376 = vmatprep.subr.bf16.mxu0 %v2704_v12  ;;  %v2751_v12 = vld [vmem:[#allocation7 + $0xa8] ss:$16 sps:$4 sm:$0xff]  }
 0x143   :  { %2377 = vmatpush3.bf16.msra.mxu0 %v2705_v13  ;;  %v2756_v13 = vld [vmem:[#allocation7 + $0xc4] ss:$16 sps:$4 sm:$0xff]  }
 0x144   :  { %2378 = vmatprep.subr.bf16.mxu0 %v2706_v14  ;;  %v2759_v14 = vld [vmem:[#allocation7 + $0xcc] ss:$16 sps:$4 sm:$0xff]  }
 0x147   :  { %2379 = vmatpush3.bf16.msra.mxu0 %v2707_v15  ;;  %v2754_v15 = vld [vmem:[#allocation7 + $0xc0] ss:$16 sps:$4 sm:$0xff]  }
 0x148   :  { %2380 = vmatprep.subr.bf16.mxu0 %v2708_v16  ;;  %v2757_v16 = vld [vmem:[#allocation7 + $0xc8] ss:$16 sps:$4 sm:$0xff]  }
 0x14b   :  { %2381 = vmatpush3.bf16.msra.mxu0 %v2709_v18  ;;  %v2762_v18 = vld [vmem:[#allocation7 + $0xe4] ss:$16 sps:$4 sm:$0xff]  }
 0x14c   :  { %2382 = vmatprep.subr.bf16.mxu0 %v2710_v19  ;;  %v2765_v19 = vld [vmem:[#allocation7 + $0xec] ss:$16 sps:$4 sm:$0xff]  }
 0x14f   :  { %2383 = vmatpush3.bf16.msra.mxu0 %v2711_v20  ;;  %v2760_v20 = vld [vmem:[#allocation7 + $0xe0] ss:$16 sps:$4 sm:$0xff]  }
 0x150   :  { %2384 = vmatprep.subr.bf16.mxu0 %v2712_v23  ;;  %v2763_v23 = vld [vmem:[#allocation7 + $0xe8] ss:$16 sps:$4 sm:$0xff]  }
 0x153   :  { %2385 = vmatpush3.bf16.msra.mxu0 %v2713_v24 }
 0x154   :  { %2386 = vmatprep.subr.bf16.mxu0 %v2714_v25  ;;  %v2325_v25 = vld [vmem:[%s3086_s6] ss:$0 sm:$0xff]  ;;  %s2881_s6 = smov [#allocation8]  }
 0x155   :  { %s2087_s13 = sshll.u32 %s2881_s6, 4  ;;  %s2088_s13 = int_to_ptr.vmem [resolvable:$true] %s2087_s13 }
 0x156   :  { %p2845_p11 = scmp.lt.s32.totalorder %s2088_s13, %s2088_s13 }
 0x157   :  { %2387 = vmatpush3.bf16.msra.mxu0 %v2715_v26 }
 0x158   :  { %2388 = vmatprep.subr.bf16.mxu0 %v2716_v27 }
 0x191   :  { %v602_v21 = vpop.f32.mrb[0].mxu0 }
 0x192   :  { %v643_v8 = vpop.f32.mrb[0].mxu1  ;;  %v604_v28 = vpop.f32.mrb[1].mxu0 }
 0x193   :  { %v644_v7 = vadd.f32 %v643_v8, %v602_v21  ;;  %v645_v29 = vpop.f32.mrb[1].mxu1  ;;  %v606_v10 = vpop.f32.mrb[2].mxu0  ;;  %v2717_v21 = vld [vmem:[#allocation5 + $0x38] sm:$0xff]   ;;  %v2718_v8 = vld [vmem:[#allocation7] ss:$16 sps:$4 sm:$0xff]  }
 0x194   :  { %v646_v30 = vadd.f32 %v645_v29, %v604_v28  ;;  %v647_v31 = vpop.f32.mrb[2].mxu1  ;;  %v607_v11 = vpop.f32.mrb[3].mxu0  ;;  %2389 = vmatpush3.bf16.msra.mxu0 %v2717_v21  ;;  %v2720_v28 = vld [vmem:[#allocation7 + $0x4] ss:$16 sps:$4 sm:$0xff]   ;;  %v2724_v10 = vld [vmem:[#allocation7 + $0x20] ss:$16 sps:$4 sm:$0xff]  }
 0x195   :  { %v648_v22 = vpop.f32.mrb[3].mxu1  ;;  %v2726_v29 = vld [vmem:[#allocation7 + $0x24] ss:$16 sps:$4 sm:$0xff]   ;;  %1995 = vmatprep.subr.bf16.mxu1 %v2720_v28  ;;  %v2730_v31 = vld [vmem:[#allocation7 + $0x40] ss:$16 sps:$4 sm:$0xff]  }
 0x196   :  { %1996 = vmatpush1.bf16.msra.mxu1 %v2718_v8  ;;  %v2738_v11 = vld [vmem:[#allocation7 + $0x64] ss:$16 sps:$4 sm:$0xff]   ;;  %v2736_v22 = vld [vmem:[#allocation7 + $0x60] ss:$16 sps:$4 sm:$0xff]  }
 0x197   :  { %1997 = vmatprep.subr.bf16.mxu1 %v2726_v29 }
 0x19a   :  { %1998 = vmatpush1.bf16.msra.mxu1 %v2724_v10  ;;  %v1825_v10 = vsub.s32 2, %v3022_v45 }
 0x1d1   :  { %v1004_v34 = vpop.f32.mrb[4].mxu0 }
 0x1d2   :  { %v1005_v35 = vadd.f32 %v1004_v34, %v644_v7  ;;  %v1045_v36 = vpop.f32.mrb[4].mxu1  ;;  %v1006_v17 = vpop.f32.mrb[5].mxu0  ;;  %v2723_v7 = vld [vmem:[#allocation7 + $0xc] ss:$16 sps:$4 sm:$0xff]  }
 0x1d3   :  { %v1007_v37 = vadd.f32 %v1006_v17, %v646_v30  ;;  %v1047_v38 = vpop.f32.mrb[5].mxu1  ;;  %v1008_v39 = vpop.f32.mrb[6].mxu0  ;;  %2036 = vmatprep.subr.bf16.mxu0 %v2723_v7  ;;  %v2732_v30 = vld [vmem:[#allocation7 + $0x44] ss:$16 sps:$4 sm:$0xff]  }
 0x1d4   :  { %v1046_v40 = vadd.f32 %v1045_v36, %v1005_v35  ;;  %v1049_v41 = vpop.f32.mrb[6].mxu1  ;;  %v1009_v42 = vpop.f32.mrb[7].mxu0  ;;  %1999 = vmatprep.subr.bf16.mxu1 %v2732_v30  ;;  %v1588_v39 = vld [vmem:[%s3084_s4] sm:$0x3] }
 0x1d5   :  { %v1048_v43 = vadd.f32 %v1047_v38, %v1007_v37  ;;  %v1050_v44 = vpop.f32.mrb[7].mxu1  ;;  %2000 = vmatpush1.bf16.msra.mxu1 %v2730_v31  ;;  %v1574_v38 = vld [vmem:[%s3083_s3] sm:$0x3]  ;;  %v1829_v31 = vsub.s32 3, %v3022_v45 }
 0x1d6   :  { %2001 = vmatprep.subr.bf16.mxu1 %v2738_v11  ;;  %v1579_v42 = vrot.slane %v1574_v38, %v3025_v46  ;;  %v1813_v30 = vld [vmem:[%s3088_s8] sm:$0xf]  ;;  %s2840_s8 = scalar_lea.vmem %s2088_s13, 512 }
 0x1d7   :  { %v1818_v11 = vrot.slane %v1813_v30, %v3025_v46  ;;  %p2841_p10 = scmp.ne.s32.totalorder %s2088_s13, %s2840_s8  ;;  %p2846_p12 = scmp.lt.s32.totalorder %s2840_s8, %s2840_s8 }
 0x1d9   :  { %2002 = vmatpush1.bf16.msra.mxu1 %v2736_v22  ;;  %v1826_v22 = vrot.slane %v1813_v30, %v1825_v10  ;;  %p2847_p13 = por %p2846_p12, %p2845_p11 }
 0x1db   :  { %p2848_p0 = pnand %p2847_p13, %p2841_p10 }
 0x211   :  { %v1490_v49 = vpop.f32.mrb[8].mxu0 }
 0x212   :  { %v1531_v50 = vpop.f32.mrb[8].mxu1  ;;  %v1492_v51 = vpop.f32.mrb[9].mxu0 }
 0x213   :  { %v1532_v52 = vadd.f32 %v1531_v50, %v1490_v49  ;;  %v1533_v54 = vpop.f32.mrb[9].mxu1  ;;  %v1494_v55 = vpop.f32.mrb[10].mxu0  ;;  %v1593_v49 = vrot.slane %v1588_v39, %v3025_v46  ;;  %v1597_v50 = vrot.slane %v1588_v39, %v3031_v48 }
 0x214   :  { %v1534_v6 = vadd.f32 %v1533_v54, %v1492_v51  ;;  %v1535_v57 = vpop.f32.mrb[10].mxu1  ;;  %v1495_v58 = vpop.f32.mrb[11].mxu0 }
 0x215   :  { %v1538_v59 = vadd.f32 %v1532_v52, %v1046_v40  ;;  %v1536_v60 = vpop.f32.mrb[11].mxu1  ;;  %v2721_v57 = vld [vmem:[#allocation7 + $0x8] ss:$16 sps:$4 sm:$0xff]   ;;  %v2729_v58 = vld [vmem:[#allocation7 + $0x2c] ss:$16 sps:$4 sm:$0xff]  }
 0x216   :  { %v1539_v61 = vadd.f32 %v1534_v6, %v1048_v43  ;;  %v1583_v43 = vrot.slane %v1574_v38, %v3031_v48  ;;  %v2735_v60 = vld [vmem:[#allocation7 + $0x4c] ss:$16 sps:$4 sm:$0xff]  }
 0x217   :  { %v1552_v62 = vadd.f32 %v1545_v53, %v1538_v59  ;;  %v2727_v59 = vld [vmem:[#allocation7 + $0x28] ss:$16 sps:$4 sm:$0xff]  }
 0x218   :  { %v1553_v63 = vadd.f32 %v1549_v56, %v1539_v61  ;;  %v2733_v61 = vld [vmem:[#allocation7 + $0x48] ss:$16 sps:$4 sm:$0xff]  }
 0x219   :  { %2766 = vtanh.f32 %v1552_v62  ;;  %v2741_v62 = vld [vmem:[#allocation7 + $0x6c] ss:$16 sps:$4 sm:$0xff]  }
 0x21a   :  { %2768 = vtanh.f32 %v1553_v63  ;;  %v2739_v63 = vld [vmem:[#allocation7 + $0x68] ss:$16 sps:$4 sm:$0xff]  }
 0x223   :  { %v3035_v0 = vpop.eup %2766 }
 0x224   :  { %v3037_v1 = vpop.eup %2768  ;;  %v1559_v2 = vmul.f32 %v3035_v0, %v3035_v0 }
 0x225   :  { %v1556_v3 = vadd.f32 %v3037_v1, %v3035_v0  ;;  %v1560_v4 = vmul.f32 %v3037_v1, %v3037_v1 }
 0x227   :  { %1557 = vadd.xlane.f32.xlu1 %v1556_v3  ;;  %v1561_v5 = vadd.f32 %v1560_v4, %v1559_v2  ;;  %v2742_v2 = vld [vmem:[#allocation7 + $0x80] ss:$16 sps:$4 sm:$0xff]   ;;  %v2745_v3 = vld [vmem:[#allocation7 + $0x88] ss:$16 sps:$4 sm:$0xff]   ;;  %v2750_v4 = vld [vmem:[#allocation7 + $0xa4] ss:$16 sps:$4 sm:$0xff]  }
 0x229   :  { %1562 = vadd.xlane.f32.xlu0 %v1561_v5  ;;  %v2748_v5 = vld [vmem:[#allocation7 + $0xa0] ss:$16 sps:$4 sm:$0xff]  }
 0x2b4   :  { %v1558_v32 = vpop.xlane.xlu1 %1557 }
 0x2b5   :  { %v1564_v33 = vmul.f32 0.00390625, %v1558_v32  ;;  %v1822_v32 = vrot.slane %v1813_v30, %v3031_v48 }
 0x2b6   :  { %v1563_v34 = vpop.xlane.xlu0 %1562 }
 0x2b7   :  { %v1565_v35 = vmul.f32 0.00390625, %v1563_v34  ;;  %v1566_v36 = vmul.f32 %v1564_v33, %v1564_v33  ;;  %v1568_v40 = vsub.f32 %v3035_v0, %v1564_v33  ;;  %v1569_v41 = vsub.f32 %v3037_v1, %v1564_v33  ;;  %v2744_v0 = vld [vmem:[#allocation7 + $0x84] ss:$16 sps:$4 sm:$0xff]   ;;  %v2747_v1 = vld [vmem:[#allocation7 + $0x8c] ss:$16 sps:$4 sm:$0xff]  }
 0x2b8   :  { %2003 = vmatprep.subr.bf16.mxu1 %v2744_v0  ;;  %v1830_v33 = vrot.slane %v1813_v30, %v1829_v31 }
 0x2b9   :  { %v1567_v17 = vsub.f32 %v1565_v35, %v1566_v36  ;;  %2004 = vmatpush1.bf16.msra.mxu1 %v2742_v2 }
 0x2ba   :  { %2005 = vmatprep.subr.bf16.mxu1 %v2750_v4 }
 0x2bb   :  { %v1570_v37 = vadd.f32 1e-05, %v1567_v17 }
 0x2bd   :  { %2770 = vrsqrt.f32 %v1570_v37  ;;  %2006 = vmatpush1.bf16.msra.mxu1 %v2748_v5 }
 0x2be   :  { %2007 = vmatprep.subr.bf16.mxu1 %v2756_v13 }
 0x2c1   :  { %2008 = vmatpush1.bf16.msra.mxu1 %v2754_v15 }
 0x2c2   :  { %2009 = vmatprep.subr.bf16.mxu1 %v2762_v18 }
 0x2c5   :  { %2010 = vmatpush1.bf16.msra.mxu1 %v2760_v20 }
 0x2c7   :  { %v2771_v44 = vpop.eup %2770 }
 0x2c8   :  { %v1573_v47 = vmul.f32 %v2771_v44, %v1569_v41  ;;  %v1572_v51 = vmul.f32 %v2771_v44, %v1568_v40 }
 0x2ca   :  { %v1587_v52 = vmul.f32 %v1583_v43, %v1573_v47  ;;  %v1586_v53 = vmul.f32 %v1579_v42, %v1572_v51 }
 0x2cc   :  { %v1601_v54 = vadd.f32 %v1597_v50, %v1587_v52  ;;  %v1600_v55 = vadd.f32 %v1593_v49, %v1586_v53 }
 0x2ce   :  { %v1603_v6 = vpack.c.bf16 %v1601_v54, %v1601_v54  ;;  %v1602_v56 = vpack.c.bf16 %v1600_v55, %v1600_v55 }
 0x2d0   :  { %1771 = vmatprep.mubr.bf16.mxu0 %v1603_v6 }
 0x2d1   :  { %1772 = vmatmul.mubr.bf16.vlgmr.msra.gmra.mrb[12].mxu0 %v1602_v56 }
 0x2d2   :  { %2037 = vmatpush1.bf16.msra.mxu0 %v2721_v57  ;;  %2068 = vmatprep.mubr.bf16.mxu0 %v2879_v9  ;;  %v2753_v9 = vld [vmem:[#allocation7 + $0xac] ss:$16 sps:$4 sm:$0xff]  }
 0x2d3   :  { %2038 = vmatprep.subr.bf16.mxu0 %v2729_v58 }
 0x2d6   :  { %2039 = vmatpush1.bf16.msra.mxu0 %v2727_v59 }
 0x2d7   :  { %2040 = vmatprep.subr.bf16.mxu0 %v2735_v60 }
 0x2da   :  { %2041 = vmatpush1.bf16.msra.mxu0 %v2733_v61 }
 0x2db   :  { %2042 = vmatprep.subr.bf16.mxu0 %v2741_v62 }
 0x2de   :  { %2043 = vmatpush1.bf16.msra.mxu0 %v2739_v63 }
 0x2df   :  { %2044 = vmatprep.subr.bf16.mxu0 %v2747_v1 }
 0x2e2   :  { %2045 = vmatpush1.bf16.msra.mxu0 %v2745_v3 }
 0x2e3   :  { %2046 = vmatprep.subr.bf16.mxu0 %v2753_v9 }
 0x2e6   :  { %2047 = vmatpush1.bf16.msra.mxu0 %v2751_v12 }
 0x2e7   :  { %2048 = vmatprep.subr.bf16.mxu0 %v2759_v14 }
 0x2ea   :  { %2049 = vmatpush1.bf16.msra.mxu0 %v2757_v16 }
 0x2eb   :  { %2050 = vmatprep.subr.bf16.mxu0 %v2765_v19 }
 0x2ee   :  { %2051 = vmatpush1.bf16.msra.mxu0 %v2763_v23 }
 0x3a4   :  { %v2390_v24 = vpop.f32.mrb[12].mxu0 }
 0x3a5   :  { %v2391_v26 = vpop.f32.mrb[13].mxu0 }
 0x3a6   :  { %v2392_v27 = vadd.f32 %v2391_v26, %v2390_v24  ;;  %v2393_v21 = vpop.f32.mrb[14].mxu0 }
 0x3a7   :  { %v2394_v8 = vpop.f32.mrb[15].mxu0 }
 0x3a8   :  { %v1774_v28 = vadd.f32 %v2392_v27, %v2325_v25 }
 0x3aa   :  { %2772 = vtanh.f32 %v1774_v28 }
 0x3b4   :  { %v2773_v7 = vpop.eup %2772 }
 0x3b5   :  { %v1780_v29 = vpack.c.bf16 %v2773_v7, %v2773_v7 }
 0x3b7   :  { %2028 = vmatmul.mubr.bf16.vlgmr.msra.gmra.mrb[12].mxu1 %v1780_v29  ;;  %2069 = vmatmul.mubr.bf16.vlgmr.msra.gmra.mrb[16].mxu0 %v1780_v29 }
 0x48a   :  { %v2029_v34 = vpop.f32.mrb[12].mxu1  ;;  %v2070_v35 = vpop.f32.mrb[16].mxu0 }
 0x48b   :  { %v2030_v36 = vadd.f32 %v2029_v34, %v1818_v11  ;;  %v2071_v17 = vadd.f32 %v2070_v35, %v1826_v22  ;;  %v2031_v37 = vpop.f32.mrb[13].mxu1  ;;  %v2072_v38 = vpop.f32.mrb[17].mxu0 }
 0x48c   :  { %v2032_v39 = vadd.f32 %v2031_v37, %v1822_v32  ;;  %v2073_v40 = vadd.f32 %v2072_v38, %v1830_v33  ;;  %v2033_v41 = vpop.f32.mrb[14].mxu1  ;;  %v2074_v42 = vpop.f32.mrb[18].mxu0 }
 0x48d   :  { %2077 = vst [vmem:[#allocation8] sm:$0xff] %v2030_v36  ;;  %2079 = vst [vmem:[#allocation8 + $0x10] sm:$0xff] %v2071_v17  ;;  %v2034_v45 = vpop.f32.mrb[15].mxu1  ;;  %v2075_v46 = vpop.f32.mrb[19].mxu0 }
 0x48e   :  { %2078 = vst [vmem:[#allocation8 + $0x8] sm:$0xff] %v2032_v39  ;;  %2080 = vst [vmem:[#allocation8 + $0x18] sm:$0xff] %v2073_v40 }
 0x48f   :  { %2851 = shalt.err (!%p2848_p0)
}
 0x490   :  { %s2852_s16 = scalar_lea.hbm %s3089_s9, 512 }
 0x491   :  { %p2853_p1 = scmp.ne.s32.totalorder %s3089_s9, %s2852_s16  ;;  %p2856_p2 = scmp.lt.u32.totalorder %s2852_s16, %s3089_s9 }
 0x493   :  { %p2858_p3 = pnand %p2856_p2, %p2853_p1 }
 0x495   :  { %2861 = shalt.err (!%p2858_p3)
}
 0x496   :  { %2090 = dma.vmem_to_hbm [thread:$0]  %s2088_s13, 512, %s3089_s9, [#allocation4]  }
 0x497   :  { %2866 = dma.done.wait [#allocation4], 512  }
 0x498   :  { %2867 = vsyncadd [#allocation4], 4294966784 }
 0x499   :  { %2094 = vsyncpa [#allocation3], 1 }
 0x49a   :  { %2095 = vsyncpa [#allocation6], 1 }
 0x49b   :  { %2096 = vsyncpa [#allocation4], 1 }

</bundles_post_ra>
